<compile_context>
chip_gen: v7x
topology: tpu7x:2x2x1
jax: 0.10.0
libtpu: 0.0.40
codegen_flags: <defaults>
</compile_context>

<pallas_src>
import jax
import jax.numpy as jnp
from jax import lax
from jax.experimental import pallas as pl
from jax.experimental.pallas import tpu as pltpu

LN_EPS = 1e-5  # PyTorch LayerNorm default eps

_LANE = 128
_TS_CAP = 2048                       # >2K-lane blocks give diminishing returns
_BLOCK_TARGET_BYTES = 2 * 1024 * 1024
_PLAN_VMEM_BYTES = 28 * 1024 * 1024  # conservative plan budget (fits v7x 64 MiB)
_VMEM_LIMIT_BYTES = 40 * 1024 * 1024  # raised scoped limit, ~20%+ headroom everywhere
_MXU_MLP_MIN_ELEMS = 32 * 128        # use MXU for the epilogue MLP above this C*P


def _round_up(v, m):
    return -(-v // m) * m


def _pick_spatial_tile(S, C, itemsize):
    """Largest 128-multiple spatial tile targeting ~2 MiB x-blocks within budget."""
    s_pad = _round_up(S, _LANE)
    ts = (_BLOCK_TARGET_BYTES // max(1, C * itemsize)) // _LANE * _LANE
    ts = int(max(_LANE, min(ts, _TS_CAP, s_pad)))
    # keep streamed blocks (x-in + out, double-buffered) well under the plan budget
    while ts > _LANE and 4 * C * ts * itemsize > _PLAN_VMEM_BYTES // 2:
        ts -= _LANE
    return ts


def _make_context_block_kernel(nS, ts, s_true, fused, needs_mask, use_mxu_mlp):
    """Build the fused ContextBlock kernel for grid = (B, 2 passes, nS spatial tiles)."""

    def kernel(x_ref, wm_ref, bm_ref, w1_ref, b1_ref, g_ref, bta_ref,
               w2_ref, b2_ref, o_ref, m_sc, l_sc, acc_sc, add_sc, *cache):
        x_cache = cache[0] if fused else None
        pass_idx = pl.program_id(1)
        s = pl.program_id(2)

        # ---- pass 0: stream x, online-softmax attention pooling, epilogue MLP ----
        @pl.when(pass_idx == 0)
        def _pool():
            @pl.when(s == 0)
            def _():
                m_sc[...] = jnp.full_like(m_sc, -jnp.inf)
                l_sc[...] = jnp.zeros_like(l_sc)
                acc_sc[...] = jnp.zeros_like(acc_sc)

            x_blk = x_ref[...]                       # (C, ts), original dtype
            if fused:
                x_cache[s] = x_blk                   # keep resident for pass 1
            x = x_blk.astype(jnp.float32)

            # conv_mask 1x1 (C->1): channels on sublanes -> multiply + sublane reduce.
            logits = jnp.sum(x * wm_ref[...], axis=0, keepdims=True) + bm_ref[...]
            if needs_mask:
                col = lax.broadcasted_iota(jnp.int32, (1, ts), 1)
                logits = jnp.where(s * ts + col < s_true, logits, -jnp.inf)

            # Online softmax accumulation across spatial tiles.
            m_prev = m_sc[...]                                           # (1, 1)
            m_new = jnp.maximum(m_prev, jnp.max(logits, axis=1, keepdims=True))
            alpha = jnp.exp(m_prev - m_new)
            p = jnp.exp(logits - m_new)                                  # (1, ts)
            l_sc[...] = alpha * l_sc[...] + jnp.sum(p, axis=1, keepdims=True)
            acc_sc[...] = alpha * acc_sc[...] + jnp.sum(x * p, axis=1, keepdims=True)
            m_sc[...] = m_new

            # channel_add_conv: 1x1 (C->P) -> LayerNorm([P,1,1]) -> ReLU -> 1x1 (P->C)
            @pl.when(s == nS - 1)
            def _mlp():
                ctx = acc_sc[...] / l_sc[...]                            # (C, 1)
                if use_mxu_mlp:
                    t = lax.dot_general(ctx, w1_ref[...], (((0,), (0,)), ((), ())),
                                        preferred_element_type=jnp.float32)   # (1, P)
                else:
                    t = jnp.sum(w1_ref[...] * ctx, axis=0, keepdims=True)      # (1, P)
                t = t + b1_ref[...]
                mu = jnp.mean(t, axis=1, keepdims=True)
                var = jnp.mean((t - mu) * (t - mu), axis=1, keepdims=True)
                t = (t - mu) * lax.rsqrt(var + LN_EPS) * g_ref[...] + bta_ref[...]
                t = jnp.maximum(t, 0.0)                                  # (1, P)
                if use_mxu_mlp:
                    add = lax.dot_general(w2_ref[...], t, (((1,), (1,)), ((), ())),
                                          preferred_element_type=jnp.float32)  # (C, 1)
                else:
                    add = jnp.sum(w2_ref[...] * t, axis=1, keepdims=True)       # (C, 1)
                add_sc[...] = add + b2_ref[...]

        # ---- pass 1: out = x + add (f32 add, single cast at the store) ----
        @pl.when(pass_idx == 1)
        def _write():
            src = x_cache[s] if fused else x_ref[...]
            o_ref[...] = (src.astype(jnp.float32) + add_sc[...]).astype(o_ref.dtype)

    return kernel


def context_block_forward(x_nchw, kernel_params):
    """Forward pass of ContextBlock (pooling_type='att', fusion=('channel_add',))."""
    wm, bm, w1t, b1, g, bta, w2, b2 = kernel_params
    B, C, H, W = x_nchw.shape
    P = w1t.shape[1]
    S = H * W
    itemsize = x_nchw.dtype.itemsize

    ts = _pick_spatial_tile(S, C, itemsize)
    Sp = _round_up(S, ts)
    nS = Sp // ts
    needs_mask = Sp != S

    x = x_nchw.reshape(B, C, S)                      # free reshape, no transpose
    if needs_mask:
        x = jnp.pad(x, ((0, 0), (0, 0), (0, Sp - S)))

    # Fuse the output pass (x read from HBM exactly once) when the per-batch slab
    # plus double-buffered streamed blocks and weights fit the VMEM plan budget.
    weights_bytes = 2 * 4 * (2 * C * P + 2 * C + 3 * P + 1)
    scratch_bytes = 4 * (2 * C + 2)
    stream_bytes = 4 * C * ts * itemsize             # x-in + out, double-buffered
    cache_bytes = C * Sp * itemsize
    fused = (cache_bytes + stream_bytes + weights_bytes + scratch_bytes
             <= _PLAN_VMEM_BYTES)

    use_mxu_mlp = (C * P) >= _MXU_MLP_MIN_ELEMS

    kernel = _make_context_block_kernel(nS, ts, S, fused, needs_mask, use_mxu_mlp)

    def _wspec(shape):
        # Small parameter array, DMA'd once (constant index map) and VMEM-resident.
        return pl.BlockSpec(shape, lambda b, p, s, _n=len(shape): (0,) * _n)

    if fused:
        x_index = lambda b, p, s: (b, 0, s * (1 - p))   # pass 1: stay on block 0
    else:
        x_index = lambda b, p, s: (b, 0, s)             # pass 1: re-stream x

    scratch = [pltpu.VMEM((1, 1), jnp.float32),   # running max
               pltpu.VMEM((1, 1), jnp.float32),   # running sum of exp
               pltpu.VMEM((C, 1), jnp.float32),   # weighted-sum accumulator
               pltpu.VMEM((C, 1), jnp.float32)]   # channel_add term
    if fused:
        scratch.append(pltpu.VMEM((nS, C, ts), x.dtype))   # resident x slab

    out = pl.pallas_call(
        kernel,
        out_shape=jax.ShapeDtypeStruct((B, C, Sp), x.dtype),
        grid=(B, 2, nS),
        in_specs=[
            pl.BlockSpec((None, C, ts), x_index),
            _wspec((C, 1)),   # conv_mask weight
            _wspec((1, 1)),   # conv_mask bias
            _wspec((C, P)),   # channel_add_conv[0].weight (transposed)
            _wspec((1, P)),   # channel_add_conv[0].bias
            _wspec((1, P)),   # LayerNorm weight
            _wspec((1, P)),   # LayerNorm bias
            _wspec((C, P)),   # channel_add_conv[3].weight
            _wspec((C, 1)),   # channel_add_conv[3].bias
        ],
        out_specs=pl.BlockSpec((None, C, ts), lambda b, p, s: (b, 0, s * p)),
        scratch_shapes=scratch,
        compiler_params=pltpu.CompilerParams(
            dimension_semantics=("parallel", "arbitrary", "arbitrary"),
            vmem_limit_bytes=_VMEM_LIMIT_BYTES),
    )(x, wm, bm, w1t, b1, g, bta, w2, b2)

    if needs_mask:
        out = out[:, :, :S]
    return out.reshape(B, C, H, W)


def init_params(key, inplanes, ratio):
    """Deterministic synthetic parameters (PyTorch layouts) plus kernel layouts.

    NOTE: the PyTorch module zero-inits the last conv of channel_add_conv
    (last_zero_init), which would make the block an identity; random values are used
    here so the test exercises the full datapath.
    """
    planes = int(inplanes * ratio)
    ks = jax.random.split(key, 8)
    wm_t = 0.2 * jax.random.normal(ks[0], (1, inplanes, 1, 1), jnp.float32)
    bm_t = 0.1 * jax.random.normal(ks[1], (1,), jnp.float32)
    w1_t = 0.2 * jax.random.normal(ks[2], (planes, inplanes, 1, 1), jnp.float32)
    b1_t = 0.1 * jax.random.normal(ks[3], (planes,), jnp.float32)
    g_t = 1.0 + 0.1 * jax.random.normal(ks[4], (planes, 1, 1), jnp.float32)
    bt_t = 0.1 * jax.random.normal(ks[5], (planes, 1, 1), jnp.float32)
    w2_t = 0.2 * jax.random.normal(ks[6], (inplanes, planes, 1, 1), jnp.float32)
    b2_t = 0.1 * jax.random.normal(ks[7], (inplanes,), jnp.float32)

    kernel_params = (
        wm_t[0, :, 0, 0].reshape(inplanes, 1),   # (C, 1)
        bm_t.reshape(1, 1),                      # (1, 1)
        w1_t[:, :, 0, 0].T,                      # (C, P)
        b1_t.reshape(1, planes),                 # (1, P)
        g_t.reshape(1, planes),                  # (1, P)
        bt_t.reshape(1, planes),                 # (1, P)
        w2_t[:, :, 0, 0],                        # (C, P)
        b2_t.reshape(inplanes, 1),               # (C, 1)
    )
    torch_params = (wm_t, bm_t, w1_t, b1_t, g_t, bt_t, w2_t, b2_t)
    return kernel_params, torch_params


def ref_forward(x, torch_params):
    """Pure-JAX reference mirroring the PyTorch ContextBlock forward (exact f32)."""
    hi = jax.lax.Precision.HIGHEST
    wm_t, bm_t, w1_t, b1_t, g_t, bt_t, w2_t, b2_t = torch_params
    B, C, H, W = x.shape
    S = H * W
    xf = x.reshape(B, C, S).astype(jnp.float32)
    logits = jnp.einsum('bcs,c->bs', xf, wm_t[0, :, 0, 0], precision=hi) + bm_t[0]
    attn = jax.nn.softmax(logits, axis=-1)                          # (B, S)
    ctx = jnp.einsum('bcs,bs->bc', xf, attn, precision=hi)          # (B, C)
    t = jnp.einsum('bc,pc->bp', ctx, w1_t[:, :, 0, 0], precision=hi) + b1_t
    mu = jnp.mean(t, axis=-1, keepdims=True)
    var = jnp.mean((t - mu) ** 2, axis=-1, keepdims=True)
    t = (t - mu) * lax.rsqrt(var + LN_EPS) * g_t.reshape(1, -1) + bt_t.reshape(1, -1)
    t = jax.nn.relu(t)
    add = jnp.einsum('bp,cp->bc', t, w2_t[:, :, 0, 0], precision=hi) + b2_t
    return x + add[:, :, None, None]


if __name__ == "__main__":
    def run_case(key, B, inplanes, ratio, H, W, tol):
        kx, kp = jax.random.split(key)
        x = jax.random.normal(kx, (B, inplanes, H, W), jnp.float32)   # NCHW
        kernel_params, torch_params = init_params(kp, inplanes, ratio)
        out = jax.block_until_ready(context_block_forward(x, kernel_params))
        ref = jax.block_until_ready(ref_forward(x, torch_params))
        assert out.shape == (B, inplanes, H, W)
        err = float(jnp.max(jnp.abs(out - ref)))
        assert err < tol, f"mismatch vs pure-JAX reference: {err}"

    root = jax.random.PRNGKey(0)
    k1, k2 = jax.random.split(root)

    # Case 1: S=4096 -> two 2048-lane spatial tiles, exercising the cross-tile
    #         online-softmax accumulation and the fused (x-resident) output pass.
    run_case(k1, B=2, inplanes=32, ratio=0.25, H=64, W=64, tol=1e-4)

    # Case 2: S=196 (not a multiple of 128) -> padded to 256 lanes with in-kernel
    #         masking of the last tile.
    run_case(k2, B=2, inplanes=16, ratio=0.5, H=14, W=14, tol=1e-4)

    print("KERNEL_OK")
</pallas_src>

<mosaic_0001>
module attributes {stable_mosaic.version = 11 : i64} {
  func.func @kernel(%arg0: i32, %arg1: i32, %arg2: i32, %arg3: memref<1x32x2048xf32, #tpu.memory_space<vmem>>, %arg4: memref<32x1xf32, #tpu.memory_space<vmem>>, %arg5: memref<1x1xf32, #tpu.memory_space<vmem>>, %arg6: memref<32x8xf32, #tpu.memory_space<vmem>>, %arg7: memref<1x8xf32, #tpu.memory_space<vmem>>, %arg8: memref<1x8xf32, #tpu.memory_space<vmem>>, %arg9: memref<1x8xf32, #tpu.memory_space<vmem>>, %arg10: memref<32x8xf32, #tpu.memory_space<vmem>>, %arg11: memref<32x1xf32, #tpu.memory_space<vmem>>, %arg12: memref<1x32x2048xf32, #tpu.memory_space<vmem>>, %arg13: memref<1x1xf32, #tpu.memory_space<vmem>>, %arg14: memref<1x1xf32, #tpu.memory_space<vmem>>, %arg15: memref<32x1xf32, #tpu.memory_space<vmem>>, %arg16: memref<32x1xf32, #tpu.memory_space<vmem>>, %arg17: memref<2x32x2048xf32, #tpu.memory_space<vmem>>) attributes {dimension_semantics = [#tpu.dimension_semantics<parallel>, #tpu.dimension_semantics<arbitrary>, #tpu.dimension_semantics<arbitrary>], iteration_bounds = array<i64: 2, 2, 2>, scalar_prefetch = 0 : i64, scratch_operands = 5 : i64, tpu.core_type = #tpu.core_type<tc>, window_params = [{transform_indices = @transform_0, window_bounds = array<i64: 1, 32, 2048>}, {pipeline_mode = #tpu.pipeline_mode<synchronous>, transform_indices = @transform_1, window_bounds = array<i64: 32, 1>}, {pipeline_mode = #tpu.pipeline_mode<synchronous>, transform_indices = @transform_2, window_bounds = array<i64: 1, 1>}, {pipeline_mode = #tpu.pipeline_mode<synchronous>, transform_indices = @transform_3, window_bounds = array<i64: 32, 8>}, {pipeline_mode = #tpu.pipeline_mode<synchronous>, transform_indices = @transform_4, window_bounds = array<i64: 1, 8>}, {pipeline_mode = #tpu.pipeline_mode<synchronous>, transform_indices = @transform_5, window_bounds = array<i64: 1, 8>}, {pipeline_mode = #tpu.pipeline_mode<synchronous>, transform_indices = @transform_6, window_bounds = array<i64: 1, 8>}, {pipeline_mode = #tpu.pipeline_mode<synchronous>, transform_indices = @transform_7, window_bounds = array<i64: 32, 8>}, {pipeline_mode = #tpu.pipeline_mode<synchronous>, transform_indices = @transform_8, window_bounds = array<i64: 32, 1>}, {transform_indices = @transform_9, window_bounds = array<i64: 1, 32, 2048>}]} {
    %c0_i32 = arith.constant 0 : i32
    %0 = arith.cmpi eq, %arg1, %c0_i32 : i32
    %1 = arith.extui %0 : i1 to i32
    %c0_i32_0 = arith.constant 0 : i32
    %2 = arith.cmpi ne, %1, %c0_i32_0 : i32
    scf.if %2 {
      %c0_i32_2 = arith.constant 0 : i32
      %6 = arith.cmpi eq, %arg2, %c0_i32_2 : i32
      %7 = arith.extui %6 : i1 to i32
      %c0_i32_3 = arith.constant 0 : i32
      %8 = arith.cmpi ne, %7, %c0_i32_3 : i32
      scf.if %8 {
        %cst_29 = arith.constant 0xFF800000 : f32
        %51 = vector.broadcast %cst_29 : f32 to vector<1x1xf32>
        %c0_30 = arith.constant 0 : index
        %c0_31 = arith.constant 0 : index
        %52 = vector.load %arg13[%c0_30, %c0_31] : memref<1x1xf32, #tpu.memory_space<vmem>>, vector<1x1xf32>
        tpu.vector_store %arg13[%c0_30, %c0_31], %51 {strides = array<i32>} : memref<1x1xf32, #tpu.memory_space<vmem>>, vector<1x1xf32>,
        %cst_32 = arith.constant 0.000000e+00 : f32
        %53 = vector.broadcast %cst_32 : f32 to vector<1x1xf32>
        %c0_33 = arith.constant 0 : index
        %c0_34 = arith.constant 0 : index
        %54 = vector.load %arg14[%c0_33, %c0_34] : memref<1x1xf32, #tpu.memory_space<vmem>>, vector<1x1xf32>
        tpu.vector_store %arg14[%c0_33, %c0_34], %53 {strides = array<i32>} : memref<1x1xf32, #tpu.memory_space<vmem>>, vector<1x1xf32>,
        %cst_35 = arith.constant 0.000000e+00 : f32
        %55 = vector.broadcast %cst_35 : f32 to vector<32x1xf32>
        %c0_36 = arith.constant 0 : index
        %c0_37 = arith.constant 0 : index
        %56 = vector.load %arg15[%c0_36, %c0_37] : memref<32x1xf32, #tpu.memory_space<vmem>>, vector<32x1xf32>
        tpu.vector_store %arg15[%c0_36, %c0_37], %55 {strides = array<i32>} : memref<32x1xf32, #tpu.memory_space<vmem>>, vector<32x1xf32>,
      } else {
      }
      %c0 = arith.constant 0 : index
      %c0_4 = arith.constant 0 : index
      %c0_5 = arith.constant 0 : index
      %9 = vector.load %arg3[%c0, %c0_4, %c0_5] : memref<1x32x2048xf32, #tpu.memory_space<vmem>>, vector<1x32x2048xf32>
      %10 = vector.shape_cast %9 : vector<1x32x2048xf32> to vector<32x2048xf32>
      %11 = arith.index_cast %arg2 : i32 to index
      %c0_6 = arith.constant 0 : index
      %c0_7 = arith.constant 0 : index
      %12 = vector.load %arg17[%11, %c0_6, %c0_7] : memref<2x32x2048xf32, #tpu.memory_space<vmem>>, vector<1x32x2048xf32>
      %13 = vector.shape_cast %12 : vector<1x32x2048xf32> to vector<32x2048xf32>
      %14 = vector.shape_cast %10 : vector<32x2048xf32> to vector<1x32x2048xf32>
      tpu.vector_store %arg17[%11, %c0_6, %c0_7], %14 {strides = array<i32>} : memref<2x32x2048xf32, #tpu.memory_space<vmem>>, vector<1x32x2048xf32>,
      %c0_8 = arith.constant 0 : index
      %c0_9 = arith.constant 0 : index
      %15 = vector.load %arg4[%c0_8, %c0_9] : memref<32x1xf32, #tpu.memory_space<vmem>>, vector<32x1xf32>
      %16 = vector.broadcast %15 : vector<32x1xf32> to vector<32x2048xf32>
      %17 = arith.mulf %10, %16 : vector<32x2048xf32>
      %cst = arith.constant dense<0.000000e+00> : vector<2048xf32>
      %18 = vector.multi_reduction <add>, %17, %cst [0] : vector<32x2048xf32> to vector<2048xf32>
      %19 = vector.shape_cast %18 : vector<2048xf32> to vector<1x2048xf32>
      %c0_10 = arith.constant 0 : index
      %c0_11 = arith.constant 0 : index
      %20 = vector.load %arg5[%c0_10, %c0_11] : memref<1x1xf32, #tpu.memory_space<vmem>>, vector<1x1xf32>
      %21 = vector.broadcast %20 : vector<1x1xf32> to vector<1x2048xf32>
      %22 = arith.addf %19, %21 : vector<1x2048xf32>
      %c0_12 = arith.constant 0 : index
      %c0_13 = arith.constant 0 : index
      %23 = vector.load %arg13[%c0_12, %c0_13] : memref<1x1xf32, #tpu.memory_space<vmem>>, vector<1x1xf32>
      %cst_14 = arith.constant dense<0xFF800000> : vector<1xf32>
      %24 = vector.multi_reduction <maximumf>, %22, %cst_14 [1] : vector<1x2048xf32> to vector<1xf32>
      %25 = vector.shape_cast %24 : vector<1xf32> to vector<1x1xf32>
      %26 = arith.maximumf %23, %25 : vector<1x1xf32>
      %27 = arith.subf %23, %26 : vector<1x1xf32>
      %28 = math.exp %27 : vector<1x1xf32>
      %29 = vector.broadcast %26 : vector<1x1xf32> to vector<1x2048xf32>
      %30 = arith.subf %22, %29 : vector<1x2048xf32>
      %31 = math.exp %30 : vector<1x2048xf32>
      %c0_15 = arith.constant 0 : index
      %c0_16 = arith.constant 0 : index
      %32 = vector.load %arg14[%c0_15, %c0_16] : memref<1x1xf32, #tpu.memory_space<vmem>>, vector<1x1xf32>
      %33 = arith.mulf %28, %32 : vector<1x1xf32>
      %cst_17 = arith.constant dense<0.000000e+00> : vector<1xf32>
      %34 = vector.multi_reduction <add>, %31, %cst_17 [1] : vector<1x2048xf32> to vector<1xf32>
      %35 = vector.shape_cast %34 : vector<1xf32> to vector<1x1xf32>
      %36 = arith.addf %33, %35 : vector<1x1xf32>
      %c0_18 = arith.constant 0 : index
      %c0_19 = arith.constant 0 : index
      %37 = vector.load %arg14[%c0_18, %c0_19] : memref<1x1xf32, #tpu.memory_space<vmem>>, vector<1x1xf32>
      tpu.vector_store %arg14[%c0_18, %c0_19], %36 {strides = array<i32>} : memref<1x1xf32, #tpu.memory_space<vmem>>, vector<1x1xf32>,
      %c0_20 = arith.constant 0 : index
      %c0_21 = arith.constant 0 : index
      %38 = vector.load %arg15[%c0_20, %c0_21] : memref<32x1xf32, #tpu.memory_space<vmem>>, vector<32x1xf32>
      %39 = vector.broadcast %28 : vector<1x1xf32> to vector<32x1xf32>
      %40 = arith.mulf %39, %38 : vector<32x1xf32>
      %41 = vector.broadcast %31 : vector<1x2048xf32> to vector<32x2048xf32>
      %42 = arith.mulf %10, %41 : vector<32x2048xf32>
      %cst_22 = arith.constant dense<0.000000e+00> : vector<32xf32>
      %43 = vector.multi_reduction <add>, %42, %cst_22 [1] : vector<32x2048xf32> to vector<32xf32>
      %44 = vector.shape_cast %43 : vector<32xf32> to vector<32x1xf32>
      %45 = arith.addf %40, %44 : vector<32x1xf32>
      %c0_23 = arith.constant 0 : index
      %c0_24 = arith.constant 0 : index
      %46 = vector.load %arg15[%c0_23, %c0_24] : memref<32x1xf32, #tpu.memory_space<vmem>>, vector<32x1xf32>
      tpu.vector_store %arg15[%c0_23, %c0_24], %45 {strides = array<i32>} : memref<32x1xf32, #tpu.memory_space<vmem>>, vector<32x1xf32>,
      %c0_25 = arith.constant 0 : index
      %c0_26 = arith.constant 0 : index
      %47 = vector.load %arg13[%c0_25, %c0_26] : memref<1x1xf32, #tpu.memory_space<vmem>>, vector<1x1xf32>
      tpu.vector_store %arg13[%c0_25, %c0_26], %26 {strides = array<i32>} : memref<1x1xf32, #tpu.memory_space<vmem>>, vector<1x1xf32>,
      %c1_i32_27 = arith.constant 1 : i32
      %48 = arith.cmpi eq, %arg2, %c1_i32_27 : i32
      %49 = arith.extui %48 : i1 to i32
      %c0_i32_28 = arith.constant 0 : i32
      %50 = arith.cmpi ne, %49, %c0_i32_28 : i32
      scf.if %50 {
        %c0_29 = arith.constant 0 : index
        %c0_30 = arith.constant 0 : index
        %51 = vector.load %arg15[%c0_29, %c0_30] : memref<32x1xf32, #tpu.memory_space<vmem>>, vector<32x1xf32>
        %c0_31 = arith.constant 0 : index
        %c0_32 = arith.constant 0 : index
        %52 = vector.load %arg14[%c0_31, %c0_32] : memref<1x1xf32, #tpu.memory_space<vmem>>, vector<1x1xf32>
        %53 = vector.broadcast %52 : vector<1x1xf32> to vector<32x1xf32>
        %54 = arith.divf %51, %53 : vector<32x1xf32>
        %c0_33 = arith.constant 0 : index
        %c0_34 = arith.constant 0 : index
        %55 = vector.load %arg6[%c0_33, %c0_34] : memref<32x8xf32, #tpu.memory_space<vmem>>, vector<32x8xf32>
        %56 = vector.broadcast %54 : vector<32x1xf32> to vector<32x8xf32>
        %57 = arith.mulf %55, %56 : vector<32x8xf32>
        %cst_35 = arith.constant dense<0.000000e+00> : vector<8xf32>
        %58 = vector.multi_reduction <add>, %57, %cst_35 [0] : vector<32x8xf32> to vector<8xf32>
        %59 = vector.shape_cast %58 : vector<8xf32> to vector<1x8xf32>
        %c0_36 = arith.constant 0 : index
        %c0_37 = arith.constant 0 : index
        %60 = vector.load %arg7[%c0_36, %c0_37] : memref<1x8xf32, #tpu.memory_space<vmem>>, vector<1x8xf32>
        %61 = arith.addf %59, %60 : vector<1x8xf32>
        %cst_38 = arith.constant dense<0.000000e+00> : vector<1xf32>
        %62 = vector.multi_reduction <add>, %61, %cst_38 [1] : vector<1x8xf32> to vector<1xf32>
        %63 = vector.shape_cast %62 : vector<1xf32> to vector<1x1xf32>
        %cst_39 = arith.constant 8.000000e+00 : f32
        %64 = vector.broadcast %cst_39 : f32 to vector<1x1xf32>
        %65 = arith.divf %63, %64 : vector<1x1xf32>
        %66 = vector.broadcast %65 : vector<1x1xf32> to vector<1x8xf32>
        %67 = arith.subf %61, %66 : vector<1x8xf32>
        %68 = vector.broadcast %65 : vector<1x1xf32> to vector<1x8xf32>
        %69 = arith.subf %61, %68 : vector<1x8xf32>
        %70 = arith.mulf %67, %69 : vector<1x8xf32>
        %cst_40 = arith.constant dense<0.000000e+00> : vector<1xf32>
        %71 = vector.multi_reduction <add>, %70, %cst_40 [1] : vector<1x8xf32> to vector<1xf32>
        %72 = vector.shape_cast %71 : vector<1xf32> to vector<1x1xf32>
        %cst_41 = arith.constant 8.000000e+00 : f32
        %73 = vector.broadcast %cst_41 : f32 to vector<1x1xf32>
        %74 = arith.divf %72, %73 : vector<1x1xf32>
        %75 = vector.broadcast %65 : vector<1x1xf32> to vector<1x8xf32>
        %76 = arith.subf %61, %75 : vector<1x8xf32>
        %cst_42 = arith.constant 9.99999974E-6 : f32
        %77 = vector.broadcast %cst_42 : f32 to vector<1x1xf32>
        %78 = arith.addf %74, %77 : vector<1x1xf32>
        %79 = math.rsqrt %78 : vector<1x1xf32>
        %80 = vector.broadcast %79 : vector<1x1xf32> to vector<1x8xf32>
        %81 = arith.mulf %76, %80 : vector<1x8xf32>
        %c0_43 = arith.constant 0 : index
        %c0_44 = arith.constant 0 : index
        %82 = vector.load %arg8[%c0_43, %c0_44] : memref<1x8xf32, #tpu.memory_space<vmem>>, vector<1x8xf32>
        %83 = arith.mulf %81, %82 : vector<1x8xf32>
        %c0_45 = arith.constant 0 : index
        %c0_46 = arith.constant 0 : index
        %84 = vector.load %arg9[%c0_45, %c0_46] : memref<1x8xf32, #tpu.memory_space<vmem>>, vector<1x8xf32>
        %85 = arith.addf %83, %84 : vector<1x8xf32>
        %cst_47 = arith.constant 0.000000e+00 : f32
        %86 = vector.broadcast %cst_47 : f32 to vector<1x8xf32>
        %87 = arith.maximumf %85, %86 : vector<1x8xf32>
        %c0_48 = arith.constant 0 : index
        %c0_49 = arith.constant 0 : index
        %88 = vector.load %arg10[%c0_48, %c0_49] : memref<32x8xf32, #tpu.memory_space<vmem>>, vector<32x8xf32>
        %89 = vector.broadcast %87 : vector<1x8xf32> to vector<32x8xf32>
        %90 = arith.mulf %88, %89 : vector<32x8xf32>
        %cst_50 = arith.constant dense<0.000000e+00> : vector<32xf32>
        %91 = vector.multi_reduction <add>, %90, %cst_50 [1] : vector<32x8xf32> to vector<32xf32>
        %92 = vector.shape_cast %91 : vector<32xf32> to vector<32x1xf32>
        %c0_51 = arith.constant 0 : index
        %c0_52 = arith.constant 0 : index
        %93 = vector.load %arg11[%c0_51, %c0_52] : memref<32x1xf32, #tpu.memory_space<vmem>>, vector<32x1xf32>
        %94 = arith.addf %92, %93 : vector<32x1xf32>
        %c0_53 = arith.constant 0 : index
        %c0_54 = arith.constant 0 : index
        %95 = vector.load %arg16[%c0_53, %c0_54] : memref<32x1xf32, #tpu.memory_space<vmem>>, vector<32x1xf32>
        tpu.vector_store %arg16[%c0_53, %c0_54], %94 {strides = array<i32>} : memref<32x1xf32, #tpu.memory_space<vmem>>, vector<32x1xf32>,
      } else {
      }
    } else {
    }
    %c1_i32 = arith.constant 1 : i32
    %3 = arith.cmpi eq, %arg1, %c1_i32 : i32
    %4 = arith.extui %3 : i1 to i32
    %c0_i32_1 = arith.constant 0 : i32
    %5 = arith.cmpi ne, %4, %c0_i32_1 : i32
    scf.if %5 {
      %6 = arith.index_cast %arg2 : i32 to index
      %c0 = arith.constant 0 : index
      %c0_2 = arith.constant 0 : index
      %7 = vector.load %arg17[%6, %c0, %c0_2] : memref<2x32x2048xf32, #tpu.memory_space<vmem>>, vector<1x32x2048xf32>
      %8 = vector.shape_cast %7 : vector<1x32x2048xf32> to vector<32x2048xf32>
      %c0_3 = arith.constant 0 : index
      %c0_4 = arith.constant 0 : index
      %9 = vector.load %arg16[%c0_3, %c0_4] : memref<32x1xf32, #tpu.memory_space<vmem>>, vector<32x1xf32>
      %10 = vector.broadcast %9 : vector<32x1xf32> to vector<32x2048xf32>
      %11 = arith.addf %8, %10 : vector<32x2048xf32>
      %c0_5 = arith.constant 0 : index
      %c0_6 = arith.constant 0 : index
      %c0_7 = arith.constant 0 : index
      %12 = vector.load %arg12[%c0_5, %c0_6, %c0_7] : memref<1x32x2048xf32, #tpu.memory_space<vmem>>, vector<1x32x2048xf32>
      %13 = vector.shape_cast %12 : vector<1x32x2048xf32> to vector<32x2048xf32>
      %14 = vector.shape_cast %11 : vector<32x2048xf32> to vector<1x32x2048xf32>
      tpu.vector_store %arg12[%c0_5, %c0_6, %c0_7], %14 {strides = array<i32>} : memref<1x32x2048xf32, #tpu.memory_space<vmem>>, vector<1x32x2048xf32>,
    } else {
    }
    return
  }
  func.func @transform_0(%arg0: i32, %arg1: i32, %arg2: i32) -> (i32, i32, i32) {
    %c1_i32 = arith.constant 1 : i32
    %0 = arith.subi %c1_i32, %arg1 : i32
    %1 = arith.muli %arg2, %0 : i32
    %c0_i32 = arith.constant 0 : i32
    %c0_i32_0 = arith.constant 0 : i32
    return %arg0, %c0_i32, %1 : i32, i32, i32
  }
  func.func @transform_1(%arg0: i32, %arg1: i32, %arg2: i32) -> (i32, i32) {
    %c0_i32 = arith.constant 0 : i32
    %c0_i32_0 = arith.constant 0 : i32
    %c0_i32_1 = arith.constant 0 : i32
    return %c0_i32, %c0_i32_0 : i32, i32
  }
  func.func @transform_2(%arg0: i32, %arg1: i32, %arg2: i32) -> (i32, i32) {
    %c0_i32 = arith.constant 0 : i32
    %c0_i32_0 = arith.constant 0 : i32
    %c0_i32_1 = arith.constant 0 : i32
    return %c0_i32, %c0_i32_0 : i32, i32
  }
  func.func @transform_3(%arg0: i32, %arg1: i32, %arg2: i32) -> (i32, i32) {
    %c0_i32 = arith.constant 0 : i32
    %c0_i32_0 = arith.constant 0 : i32
    %c0_i32_1 = arith.constant 0 : i32
    return %c0_i32, %c0_i32_0 : i32, i32
  }
  func.func @transform_4(%arg0: i32, %arg1: i32, %arg2: i32) -> (i32, i32) {
    %c0_i32 = arith.constant 0 : i32
    %c0_i32_0 = arith.constant 0 : i32
    %c0_i32_1 = arith.constant 0 : i32
    return %c0_i32, %c0_i32_0 : i32, i32
  }
  func.func @transform_5(%arg0: i32, %arg1: i32, %arg2: i32) -> (i32, i32) {
    %c0_i32 = arith.constant 0 : i32
    %c0_i32_0 = arith.constant 0 : i32
    %c0_i32_1 = arith.constant 0 : i32
    return %c0_i32, %c0_i32_0 : i32, i32
  }
  func.func @transform_6(%arg0: i32, %arg1: i32, %arg2: i32) -> (i32, i32) {
    %c0_i32 = arith.constant 0 : i32
    %c0_i32_0 = arith.constant 0 : i32
    %c0_i32_1 = arith.constant 0 : i32
    return %c0_i32, %c0_i32_0 : i32, i32
  }
  func.func @transform_7(%arg0: i32, %arg1: i32, %arg2: i32) -> (i32, i32) {
    %c0_i32 = arith.constant 0 : i32
    %c0_i32_0 = arith.constant 0 : i32
    %c0_i32_1 = arith.constant 0 : i32
    return %c0_i32, %c0_i32_0 : i32, i32
  }
  func.func @transform_8(%arg0: i32, %arg1: i32, %arg2: i32) -> (i32, i32) {
    %c0_i32 = arith.constant 0 : i32
    %c0_i32_0 = arith.constant 0 : i32
    %c0_i32_1 = arith.constant 0 : i32
    return %c0_i32, %c0_i32_0 : i32, i32
  }
  func.func @transform_9(%arg0: i32, %arg1: i32, %arg2: i32) -> (i32, i32, i32) {
    %0 = arith.muli %arg2, %arg1 : i32
    %c0_i32 = arith.constant 0 : i32
    %c0_i32_0 = arith.constant 0 : i32
    return %arg0, %c0_i32, %0 : i32, i32, i32
  }
}

</mosaic_0001>

<bundles_post_ra>
// kernel: tpu_custom_call.1
= control target key start
LH: loop header
LB: loop body
LE: loop exit
PB: predicated region body
PF: predicated region fallthrough
CT: control target
= control target key end

     0   :  { %s3280_s0 = inlined_call_operand.hbm [shape: f32[2,32,4096], index: 0, kind: input, shape index: {}]   ;;  %s3281_s1 = inlined_call_operand.vmem [shape: f32[32,1], index: 1, kind: input, shape index: {}]   ;;  %s3282_s2 = inlined_call_operand.<no memory space> [shape: f32[1,1], index: 2, kind: input, shape index: {}]   ;;  %s3283_s3 = inlined_call_operand.vmem [shape: f32[32,8], index: 3, kind: input, shape index: {}]   ;;  %s3284_s4 = inlined_call_operand.vmem [shape: f32[1,8], index: 4, kind: input, shape index: {}]   ;;  %s3285_s5 = inlined_call_operand.vmem [shape: f32[1,8], index: 5, kind: input, shape index: {}]   ;;  %s3286_s6 = inlined_call_operand.vmem [shape: f32[1,8], index: 6, kind: input, shape index: {}]   ;;  %s3287_s7 = inlined_call_operand.vmem [shape: f32[32,8], index: 7, kind: input, shape index: {}]   ;;  %s3288_s8 = inlined_call_operand.vmem [shape: f32[32,1], index: 8, kind: input, shape index: {}]   ;;  %s3289_s9 = inlined_call_operand.hbm [shape: f32[2,32,4096], index: 9, kind: output, shape index: {}]  }
   0x1   :  { %3377 = sst [smem:[#allocation98_spill]] %s3280_s0  ;;  %v14_v0 = vstv %s3282_s2 }
   0x2   :  { %3378 = sst [smem:[#allocation99_spill]] %s3281_s1  ;;  %15 = vst [vmem:[#allocation7] sm:$0x1] %v14_v0 }
   0x3   :  { %3379 = sst [smem:[#allocation100_spill]] %s3284_s4 }
   0x4   :  { %3380 = sst [smem:[#allocation101_spill]] %s3285_s5 }
   0x5   :  { %3381 = sst [smem:[#allocation102_spill]] %s3286_s6 }
   0x6   :  { %3382 = sst [smem:[#allocation103_spill]] %s3287_s7 }
   0x7   :  { %3383 = sst [smem:[#allocation104_spill]] %s3288_s8 }
   0x8   :  { %3384 = sst [smem:[#allocation105_spill]] %s3289_s9 }
   0x9   :  { %16 = vsyncpa [#allocation9], 0 }
   0xa   :  { %18 = vsyncpa [#allocation9 + $0x1], 0 }
   0xb   :  { %19 = vsyncpa [#allocation10], 0 }
   0xc   :  { %21 = vsyncpa [#allocation10 + $0x1], 0  ;;  %s1950_s11 = smov 0   ;;  %s1952_s12 = smov 0  }
   0xd   :  { %s1954_s13 = smov 0   ;;  %s1956_s14 = smov 0  }
   0xe   :  { %s1958_s15 = smov 0   ;;  %s1960_s16 = smov 0  }
   0xf   :  { %s1962_s17 = smov 0   ;;  %s1964_s2 = smov 0  }
  0x10   :  { %s1966_s18 = smov 0   ;;  %s1968_s19 = smov 0  }
  0x11   :  { %s1970_s20 = smov 0   ;;  %s1972_s21 = smov 0  }
  0x12   :  { %s1974_s22 = smov 0  }
  0x13 LB: > { %3385 = sst [smem:[#allocation14_spill]] %s1866_s18  ;;  %s3290_s23 = sadd.s32 4294967295, %s1882_s22   ;;  %s1882_s22 = sphi %s1974_s22, %s27_s22   ;;  %s1878_s21 = sphi %s1972_s21, %s3593_s21   ;;  %s1874_s20 = sphi %s1970_s20, %s3592_s20   ;;  %s1870_s19 = sphi %s1968_s19, %s3580_s19   ;;  %s1866_s18 = sphi %s1966_s18, %s3591_s18   ;;  %s1862_s2 = sphi %s1964_s2, %s3590_s2   ;;  %s1858_s17 = sphi %s1962_s17, %s3578_s17   ;;  %s1854_s16 = sphi %s1960_s16, %s3589_s16   ;;  %s1850_s15 = sphi %s1958_s15, %s3588_s15   ;;  %s1846_s14 = sphi %s1956_s14, %s3587_s14   ;;  %s1842_s13 = sphi %s1954_s13, %s3586_s13   ;;  %s1838_s12 = sphi %s1952_s12, %s3585_s12   ;;  %s1834_s11 = sphi %s1950_s11, %s3584_s11  }
  0x14   : > { %3386 = sst [smem:[#allocation15_spill]] %s1870_s19  ;;  %s39_s25 = sadd.s32 1, %s1870_s19 }
  0x15   : > { %3387 = sst [smem:[#allocation16_spill]] %s1874_s20  ;;  %s42_s26 = sadd.s32 1, %s1874_s20 }
  0x16   : > { %p40_p0 = scmp.ge.s32.totalorder %s39_s25, 2  ;;  %s46_s27 = sadd.s32 1, %s1878_s21 }
  0x17   : > { %s50_s28 = ssub.s32 1, %s1874_s20  ;;  %s59_s29 = sadd.s32 1, %s1854_s16 }
  0x18   : > { %s3595_s25 = smov (%p40_p0, %s39_s25), 0  ;;  %s3597_s26 = smov (!%p40_p0, %s42_s26), %s1874_s20 }
  0x19   : > { %3388 = sst [smem:[#allocation17_spill]] %s3595_s25  ;;  %s2026_s30 = smul.u32 %s1870_s19, %s50_s28 }
  0x1a   : > { %p66_p1 = scmp.ne.s32.totalorder %s1854_s16, %s1850_s15  ;;  %p44_p2 = scmp.ge.s32.totalorder %s3597_s26, 2 }
  0x1b   : > { %p67_p3 = scmp.eq.s32.totalorder %s1882_s22, 0  ;;  %p72_p4 = scmp.ne.s32.totalorder %s1850_s15, %s1846_s14 }
  0x1c   : > { %p73_p5 = scmp.eq.s32.totalorder %s3290_s23, 0  ;;  %s3599_s26 = smov (%p44_p2, %s3597_s26), 0 }
  0x1d   : > { %3389 = sst [smem:[#allocation18_spill]] %s3599_s26  ;;  %s3601_s27 = smov (!%p44_p2, %s46_s27), %s1878_s21 }
  0x1e   : > { %s52_s10 = ssub.s32 1, %s3599_s26  ;;  %p2039_p6 = por %p67_p3, %p66_p1 }
  0x1f   : > { %p48_p7 = scmp.ge.s32.totalorder %s3601_s27, 2  ;;  %s53_s24 = smul.u32 %s52_s10, %s3595_s25 }
  0x20   : > { %p2044_p8 = por %p73_p5, %p72_p4  ;;  %s250_s23 = smul.u32 %s1870_s19, %s1874_s20 }
  0x21   : > { %s3603_s27 = smov (%p48_p7, %s3601_s27), 0  ;;  %s55_s9 = ssub.s32 %s2026_s30, %s53_s24 }
  0x22   : > { %3392 = sst [smem:[#allocation19_spill]] %s3603_s27  ;;  %s251_s18 = smul.u32 %s3599_s26, %s3595_s25 }
  0x23   : > { %s54_s8 = ssub.s32 %s1878_s21, %s3603_s27  ;;  %s257_s7 = sadd.s32 1, %s1842_s13 }
  0x24   : > { %s56_s6 = sor.u32 %s55_s9, %s54_s8  ;;  %s253_s10 = ssub.s32 %s250_s23, %s251_s18 }
  0x25   : > { %p57_p9 = scmp.eq.s32.totalorder %s56_s6, 0  ;;  %s254_s5 = sor.u32 %s253_s10, %s54_s8 }
  0x26   : > { %p255_p10 = scmp.eq.s32.totalorder %s254_s5, 0  ;;  %p267_p11 = scmp.ne.s32.totalorder %s1842_s13, %s1838_s12 }
  0x27   : > { %s2061_s4 = scalar_select %p57_p9, %s1854_s16, %s59_s29  }
  0x28   : > { %s2064_s20 = scalar_select %p255_p10, %s1842_s13, %s257_s7  }
  0x29   : > { %s3393_s19 = sadd.s32 4294967295, %s1882_s22   ;;  %p273_p13 = scmp.ne.s32.totalorder %s1838_s12, %s1834_s11 }
  0x2a   : > { %p268_p12 = scmp.eq.s32.totalorder %s3393_s19, 7  ;;  %s3394_s24 = sadd.s32 4294967294, %s1882_s22  }
  0x2b   : > { %p274_p0 = scmp.eq.s32.totalorder %s3394_s24, 7  ;;  %p1553_p2 = scmp.lt.s32.totalorder %s1882_s22, 8 }
  0x2c   : > { %p2072_p1 = por %p268_p12, %p267_p11  ;;  %s318_s5 = sand.u32 1, %s1854_s16  }
  0x2d   : > { %p2077_p3 = por %p274_p0, %p273_p13  ;;  %s1517_s8 = sshll.u32 %s318_s5, 9 }
  0x2e   : > { %s3395_s9 = scalar_select %p2072_p1, 1, 0 }
  0x2f   : > { %s3396_s6 = scalar_select %p2077_p3, 1, 0 }
  0x30   : > { %s1518_s7 = sshll.u32 %s2026_s30, 4  ;;  %s1519_s18 = sshll.u32 %s1878_s21, 7 }
  0x31   : > { %s322_s23 = scalar_lea.vmem [#allocation8], %s1517_s8  ;;  %s330_s19 = sadd.s32 %s1519_s18, %s1518_s7 }
  0x32   : > { %s333_s29 = sshll.u32 %s322_s23, 4  ;;  %s1520_s10 = sshll.u32 %s330_s19, 7  ;;  %s2084_s29 = int_to_ptr.vmem [resolvable:$true] %s333_s29 }
  0x33   : > { %p2088_p4 = pnand %p1553_p2, %p2039_p6  ;;  %s3398_s0 = sld [smem:[#allocation98_spill]] }
  0x34   : > { %s2098_s30 = scalar_lea.sflag [#allocation9], %s318_s5 }
  0x35   : > { %p1716_p6 = pneg %p2088_p4 }
  0x39   : > { %s2095_s25 = scalar_lea.hbm %s3398_s0, %s1520_s10  ;;  %s1719_s28 = scalar_lea.hbm %s3398_s0, 32768 }
  0x3a   : > { %s1714_s8 = scalar_lea.hbm %s2095_s25, 8192  ;;  %p1720_p11 = scmp.lt.u32.totalorder %s2095_s25, %s3398_s0 }
  0x3b   : > { %p1715_p7 = scmp.ne.s32.totalorder %s2095_s25, %s1714_s8  ;;  %p1721_p12 = scmp.lt.u32.totalorder %s1719_s28, %s1714_s8 }
  0x3c   : > { %p1723_p0 = scmp.lt.u32.totalorder %s1714_s8, %s2095_s25 }
  0x3d   : > { %p1717_p9 = pnand %p1716_p6, %p1715_p7  ;;  %p1722_p13 = por %p1721_p12, %p1720_p11 }
  0x3f   : > { %p1718_p10 = pneg %p1717_p9  ;;  %p1724_p2 = por %p1723_p0, %p1722_p13 }
  0x41   : > { %p1725_p5 = pnand %p1724_p2, %p1718_p10 }
  0x43   : > { %1728 = shalt.err (!%p1725_p5)
}
  0x44   : > { %s1729_s5 = scalar_lea.vmem %s2084_s29, 8192  ;;  %s1884_s23 = smov [#allocation8]  }
  0x45   : > { %p1730_p7 = scmp.ne.s32.totalorder %s2084_s29, %s1729_s5  ;;  %s1734_s19 = sshll.u32 %s1884_s23, 4  ;;  %s1735_s19 = int_to_ptr.vmem [resolvable:$false] %s1734_s19 }
  0x46   : > { %s1736_s10 = scalar_lea.vmem %s1735_s19, 16384  ;;  %p1737_p1 = scmp.lt.s32.totalorder %s2084_s29, %s1735_s19 }
  0x47   : > { %p1732_p9 = pnand %p1730_p7, %p1716_p6  ;;  %p1738_p11 = scmp.lt.s32.totalorder %s1736_s10, %s1729_s5 }
  0x49   : > { %p1733_p3 = pneg %p1732_p9  ;;  %p1739_p12 = por %p1738_p11, %p1737_p1 }
  0x4b   : > { %p1740_p13 = pnand %p1739_p12, %p1733_p3 }
  0x4d   : > { %1743 = shalt.err (!%p1740_p13)
}
  0x4e   : > { %s1885_s8 = smov 4096   ;;  %s1886_s26 = smov 2048  }
  0x4f   : > { %s1887_s27 = smov 128   ;;  %p341_p5 = scmp.lt.s32.totalorder %s1882_s22, 9 }
  0x50   : > { %1548 = dma.hbm_to_vmem [thread:$0]  (!%p2088_p4), %s2095_s25, 8192, %s2084_s29, %s2098_s30, %s1885_s8, %s1886_s26, %s1887_s27  }
  0x51   : > { %p3399_p6 = scmp.ge.s32.totalorder %s1882_s22, 1 }
  0x53   : > { %p342_p10 = pnand %p3399_p6, %p341_p5 }
  0x54   : > { %s347_s28 = sand.u32 (!%p342_p10), 1, %s1850_s15  }
  0x55   : > { %345 = sbr.rel (%p342_p10) target bundleno = 1628 (0x65c), region = 56  ;;  %s1522_s7 = sshll.u32 (!%p342_p10), %s347_s28, 9 }
  0x56   : > { %s348_s18 = scalar_lea.sflag (!%p342_p10), [#allocation9], %s347_s28  ;;  %s2130_s5 = scalar_lea.vmem (!%p342_p10), [#allocation8], %s1522_s7 }
  0x5c   : > { %1825 = dma.done.wait (%p2044_p8), %s348_s18, 8192  }
  0x5d   : > { %1827 = vsyncadd (%p2044_p8), %s348_s18, 4294959104  ;;  %s383_s24 = sand.u32 1, %s1838_s12   ;;  %p1524_p1 = scmp.ne.s32.totalorder %s1862_s2, 0 }
  0x5e   : > { %s1523_s25 = sshll.u32 %s383_s24, 9 }
  0x5f   : > { %s2139_s29 = scalar_lea.vmem [#allocation11], %s1523_s25  ;;  %394 = sbr.rel (%p1524_p1) target bundleno = 1431 (0x597), region = 64 }
  0x66   : > { %p1525_p3 = scmp.ne.s32.totalorder %s1858_s17, 0 }
  0x67   : > { %vm399_vm0 = vcmask (!%p1525_p3), 0   ;;  %vm402_vm1 = vcmask (!%p1525_p3), 7168   ;;  %v1888_v1 = vmov (!%p1525_p3), -inf   ;;  %v1889_v2 = vmov (!%p1525_p3), 0.0  }
  0x68   : > { %398 = sbr.rel (%p1525_p3) target bundleno = 111 (0x6f), region = 68  ;;  %400 = vst.msk [vmem:[#allocation2] sm:$0x1] (!%p1525_p3), %vm399_vm0, %v1888_v1  ;;  %401 = vst.msk [vmem:[#allocation3] sm:$0x1] (!%p1525_p3), %vm399_vm0, %v1889_v2 }
  0x69   : > { %403 = vst.msk [vmem:[#allocation4] sm:$0xff] (!%p1525_p3), %vm402_vm1, %v1889_v2  ;;  %404 = vst.msk [vmem:[#allocation4 + $0x8] sm:$0xff] (!%p1525_p3), %vm402_vm1, %v1889_v2 }
  0x6a   : > { %405 = vst.msk [vmem:[#allocation4 + $0x10] sm:$0xff] (!%p1525_p3), %vm402_vm1, %v1889_v2  ;;  %406 = vst.msk [vmem:[#allocation4 + $0x18] sm:$0xff] (!%p1525_p3), %vm402_vm1, %v1889_v2 }
  0x6f PF: > { %s3400_s1 = sld [smem:[#allocation99_spill]]  ;;  %v1890_v5 = vmov 0   ;;  %v770_v8 = vld [vmem:[#allocation7] sm:$0x1]  ;;  %v2156_v9 = vld [vmem:[%s2130_s5] sm:$0xff]  ;;  %v2159_v10 = vld [vmem:[%s2130_s5 + $0x8] sm:$0xff] }
  0x70   : > { %1671 = vset.pattern.permute.xlu1 %v1890_v5  ;;  %1670 = vset.pattern.permute.xlu0 %v1890_v5  ;;  %3401 = vst [vmem:[#allocation20_spill] sm:$0xff] %v2156_v9  ;;  %3402 = vst [vmem:[#allocation21_spill] sm:$0xff] %v2159_v10  ;;  %v2162_v11 = vld [vmem:[%s2130_s5 + $0x10] sm:$0xff]  ;;  %v2165_v12 = vld [vmem:[%s2130_s5 + $0x18] sm:$0xff]  ;;  %s1539_s28 = sshll.u32 %s1858_s17, 9  ;;  %vm895_vm2 = vcmask 0  }
  0x71   : > { %3403 = vst [vmem:[#allocation22_spill] sm:$0xff] %v2162_v11  ;;  %3404 = vst [vmem:[#allocation23_spill] sm:$0xff] %v2165_v12  ;;  %v2168_v13 = vld [vmem:[%s2130_s5 + $0x20] sm:$0xff]  ;;  %v2171_v14 = vld [vmem:[%s2130_s5 + $0x28] sm:$0xff]  ;;  %s2258_s7 = scalar_lea.vmem [#allocation6], %s1539_s28  ;;  %vm1047_vm3 = vcmask 7168  }
  0x72   : > { %3405 = vst [vmem:[#allocation24_spill] sm:$0xff] %v2168_v13  ;;  %3406 = vst [vmem:[#allocation25_spill] sm:$0xff] %v2171_v14  ;;  %v2174_v15 = vld [vmem:[%s2130_s5 + $0x30] sm:$0xff]  ;;  %v2177_v16 = vld [vmem:[%s2130_s5 + $0x38] sm:$0xff]  ;;  %p1528_p8 = scmp.ne.s32.totalorder %s1858_s17, 1 }
  0x73   : > { %3407 = vst [vmem:[#allocation26_spill] sm:$0xff] %v2174_v15  ;;  %3408 = vst [vmem:[#allocation27_spill] sm:$0xff] %v2177_v16  ;;  %v2180_v17 = vld [vmem:[%s2130_s5 + $0x40] sm:$0xff]  ;;  %v2183_v18 = vld [vmem:[%s2130_s5 + $0x48] sm:$0xff]  ;;  %vm1101_vm4 = vcmask (!%p1528_p8), 64512   ;;  %s3565_s27 = sld [smem:[#allocation100_spill]] (!%p1528_p8) }
  0x74   : > { %3409 = vst [vmem:[#allocation28_spill] sm:$0xff] %v2180_v17  ;;  %3410 = vst [vmem:[#allocation29_spill] sm:$0xff] %v2183_v18  ;;  %v2186_v19 = vld [vmem:[%s2130_s5 + $0x50] sm:$0xff]  ;;  %v2189_v20 = vld [vmem:[%s2130_s5 + $0x58] sm:$0xff]  ;;  %vm1117_vm5 = vcmask (!%p1528_p8), 57344   ;;  %s3566_s18 = sld [smem:[#allocation101_spill]] (!%p1528_p8) }
  0x75   : > { %v540_v3 = vld [vmem:[%s3400_s1 + $0x10] sm:$0xff]  ;;  %v538_v4 = vld [vmem:[%s3400_s1] sm:$0xff]  ;;  %v541_v6 = vld [vmem:[%s3400_s1 + $0x18] sm:$0xff]  ;;  %3411 = vst [vmem:[#allocation30_spill] sm:$0xff] %v2186_v19  ;;  %s3567_s14 = sld [smem:[#allocation102_spill]] (!%p1528_p8)  ;;  %s3568_s19 = sld [smem:[#allocation103_spill]] (!%p1528_p8) }
  0x76   : > { %554 = vperm.xlu1 %1671, %v540_v3   ;;  %544 = vperm.xlu0 %1670, %v538_v4   ;;  %v539_v7 = vld [vmem:[%s3400_s1 + $0x8] sm:$0xff]  ;;  %3412 = vst [vmem:[#allocation31_spill] sm:$0xff] %v2189_v20  ;;  %v2198_v23 = vld [vmem:[%s2130_s5 + $0x70] sm:$0xff]  ;;  %v2201_v24 = vld [vmem:[%s2130_s5 + $0x78] sm:$0xff] }
  0x77   : > { %v2192_v21 = vld [vmem:[%s2130_s5 + $0x60] sm:$0xff]  ;;  %v2195_v22 = vld [vmem:[%s2130_s5 + $0x68] sm:$0xff]  ;;  %3415 = vst [vmem:[#allocation34_spill] sm:$0xff] %v2198_v23  ;;  %3416 = vst [vmem:[#allocation35_spill] sm:$0xff] %v2201_v24 }
  0x78   : > { %3413 = vst [vmem:[#allocation32_spill] sm:$0xff] %v2192_v21  ;;  %3414 = vst [vmem:[#allocation33_spill] sm:$0xff] %v2195_v22  ;;  %v2204_v25 = vld [vmem:[%s2130_s5 + $0x80] sm:$0xff]  ;;  %v2207_v26 = vld [vmem:[%s2130_s5 + $0x88] sm:$0xff] }
  0x79   : > { %3417 = vst [vmem:[#allocation36_spill] sm:$0xff] %v2204_v25  ;;  %3418 = vst [vmem:[#allocation37_spill] sm:$0xff] %v2207_v26  ;;  %v2210_v27 = vld [vmem:[%s2130_s5 + $0x90] sm:$0xff]  ;;  %v2213_v28 = vld [vmem:[%s2130_s5 + $0x98] sm:$0xff] }
  0x7a   : > { %559 = vperm.xlu1 %1671, %v541_v6   ;;  %549 = vperm.xlu0 %1670, %v539_v7   ;;  %3419 = vst [vmem:[#allocation38_spill] sm:$0xff] %v2210_v27  ;;  %3420 = vst [vmem:[#allocation39_spill] sm:$0xff] %v2213_v28  ;;  %v2216_v29 = vld [vmem:[%s2130_s5 + $0xa0] sm:$0xff]  ;;  %v2219_v30 = vld [vmem:[%s2130_s5 + $0xa8] sm:$0xff] }
  0x7b   : > { %3421 = vst [vmem:[#allocation40_spill] sm:$0xff] %v2216_v29  ;;  %3422 = vst [vmem:[#allocation41_spill] sm:$0xff] %v2219_v30  ;;  %v2222_v31 = vld [vmem:[%s2130_s5 + $0xb0] sm:$0xff]  ;;  %v2225_v32 = vld [vmem:[%s2130_s5 + $0xb8] sm:$0xff]  ;;  %s3569_s10 = smov (!%p1528_p8), %s3568_s19 }
  0x7c   : > { %3423 = vst [vmem:[#allocation42_spill] sm:$0xff] %v2222_v31  ;;  %3424 = vst [vmem:[#allocation43_spill] sm:$0xff] %v2225_v32  ;;  %v2228_v33 = vld [vmem:[%s2130_s5 + $0xc0] sm:$0xff]  ;;  %v2231_v34 = vld [vmem:[%s2130_s5 + $0xc8] sm:$0xff] }
  0x7d   : > { %3425 = vst [vmem:[#allocation44_spill] sm:$0xff] %v2228_v33  ;;  %3426 = vst [vmem:[#allocation45_spill] sm:$0xff] %v2231_v34  ;;  %v2234_v35 = vld [vmem:[%s2130_s5 + $0xd0] sm:$0xff]  ;;  %v2237_v36 = vld [vmem:[%s2130_s5 + $0xd8] sm:$0xff] }
  0x7e   : > { %773 = vperm.xlu0 %1670, %v770_v8   ;;  %3427 = vst [vmem:[#allocation46_spill] sm:$0xff] %v2234_v35  ;;  %3428 = vst [vmem:[#allocation47_spill] sm:$0xff] %v2237_v36  ;;  %v2241_v37 = vld [vmem:[%s2130_s5 + $0xe0] sm:$0xff]  ;;  %v2244_v38 = vld [vmem:[%s2130_s5 + $0xe8] sm:$0xff] }
  0x7f   : > { %3429 = vst [vmem:[#allocation48_spill] sm:$0xff] %v2241_v37  ;;  %3430 = vst [vmem:[#allocation49_spill] sm:$0xff] %v2244_v38  ;;  %v2247_v39 = vld [vmem:[%s2130_s5 + $0xf0] sm:$0xff]  ;;  %v2250_v40 = vld [vmem:[%s2130_s5 + $0xf8] sm:$0xff] }
  0x80   : > { %3431 = vst [vmem:[#allocation50_spill] sm:$0xff] %v2247_v39  ;;  %3432 = vst [vmem:[#allocation51_spill] sm:$0xff] %v2250_v40  ;;  %v2253_v41 = vld [vmem:[%s2130_s5 + $0x100] sm:$0xff]  ;;  %v2256_v42 = vld [vmem:[%s2130_s5 + $0x108] sm:$0xff] }
  0x81   : > { %3433 = vst [vmem:[#allocation52_spill] sm:$0xff] %v2253_v41  ;;  %3434 = vst [vmem:[#allocation53_spill] sm:$0xff] %v2256_v42  ;;  %v2323_v43 = vld [vmem:[%s2130_s5 + $0x110] sm:$0xff]  ;;  %v2326_v44 = vld [vmem:[%s2130_s5 + $0x118] sm:$0xff] }
  0x82   : > { %475 = vst [vmem:[%s2258_s7 + $0x8] sm:$0xff] %v2159_v10  ;;  %476 = vst [vmem:[%s2258_s7 + $0x10] sm:$0xff] %v2162_v11  ;;  %v2329_v45 = vld [vmem:[%s2130_s5 + $0x120] sm:$0xff]  ;;  %v2338_v46 = vld [vmem:[%s2130_s5 + $0x128] sm:$0xff] }
  0x83   : > { %477 = vst [vmem:[%s2258_s7 + $0x18] sm:$0xff] %v2165_v12  ;;  %478 = vst [vmem:[%s2258_s7 + $0x20] sm:$0xff] %v2168_v13  ;;  %v2341_v47 = vld [vmem:[%s2130_s5 + $0x130] sm:$0xff]  ;;  %v2344_v48 = vld [vmem:[%s2130_s5 + $0x138] sm:$0xff] }
  0x84   : > { %479 = vst [vmem:[%s2258_s7 + $0x28] sm:$0xff] %v2171_v14  ;;  %480 = vst [vmem:[%s2258_s7 + $0x30] sm:$0xff] %v2174_v15  ;;  %v2353_v49 = vld [vmem:[%s2130_s5 + $0x140] sm:$0xff]  ;;  %v2356_v50 = vld [vmem:[%s2130_s5 + $0x148] sm:$0xff] }
  0x85   : > { %481 = vst [vmem:[%s2258_s7 + $0x38] sm:$0xff] %v2177_v16  ;;  %482 = vst [vmem:[%s2258_s7 + $0x40] sm:$0xff] %v2180_v17  ;;  %v2359_v51 = vld [vmem:[%s2130_s5 + $0x150] sm:$0xff]  ;;  %v2368_v52 = vld [vmem:[%s2130_s5 + $0x158] sm:$0xff] }
  0x86   : > { %483 = vst [vmem:[%s2258_s7 + $0x48] sm:$0xff] %v2183_v18  ;;  %484 = vst [vmem:[%s2258_s7 + $0x50] sm:$0xff] %v2186_v19  ;;  %v2371_v53 = vld [vmem:[%s2130_s5 + $0x160] sm:$0xff]  ;;  %v2374_v54 = vld [vmem:[%s2130_s5 + $0x168] sm:$0xff] }
  0x87   : > { %485 = vst [vmem:[%s2258_s7 + $0x58] sm:$0xff] %v2189_v20  ;;  %486 = vst [vmem:[%s2258_s7 + $0x60] sm:$0xff] %v2192_v21  ;;  %v2383_v55 = vld [vmem:[%s2130_s5 + $0x170] sm:$0xff]  ;;  %v2386_v56 = vld [vmem:[%s2130_s5 + $0x178] sm:$0xff] }
  0x88   : > { %487 = vst [vmem:[%s2258_s7 + $0x68] sm:$0xff] %v2195_v22  ;;  %488 = vst [vmem:[%s2258_s7 + $0x70] sm:$0xff] %v2198_v23  ;;  %v2389_v57 = vld [vmem:[%s2130_s5 + $0x180] sm:$0xff]  ;;  %v2398_v58 = vld [vmem:[%s2130_s5 + $0x188] sm:$0xff] }
  0x89   : > { %489 = vst [vmem:[%s2258_s7 + $0x78] sm:$0xff] %v2201_v24  ;;  %490 = vst [vmem:[%s2258_s7 + $0x80] sm:$0xff] %v2204_v25  ;;  %v2401_v59 = vld [vmem:[%s2130_s5 + $0x190] sm:$0xff]  ;;  %v2404_v60 = vld [vmem:[%s2130_s5 + $0x198] sm:$0xff] }
  0x8a   : > { %491 = vst [vmem:[%s2258_s7 + $0x88] sm:$0xff] %v2207_v26  ;;  %492 = vst [vmem:[%s2258_s7 + $0x90] sm:$0xff] %v2210_v27  ;;  %v2413_v61 = vld [vmem:[%s2130_s5 + $0x1a0] sm:$0xff]  ;;  %v2416_v62 = vld [vmem:[%s2130_s5 + $0x1a8] sm:$0xff] }
  0x8b   : > { %493 = vst [vmem:[%s2258_s7 + $0x98] sm:$0xff] %v2213_v28  ;;  %494 = vst [vmem:[%s2258_s7 + $0xa0] sm:$0xff] %v2216_v29  ;;  %v2419_v63 = vld [vmem:[%s2130_s5 + $0x1b0] sm:$0xff]  ;;  %v2428_v0 = vld [vmem:[%s2130_s5 + $0x1b8] sm:$0xff] }
  0x8c   : > { %495 = vst [vmem:[%s2258_s7 + $0xa8] sm:$0xff] %v2219_v30  ;;  %496 = vst [vmem:[%s2258_s7 + $0xb0] sm:$0xff] %v2222_v31  ;;  %v2431_v1 = vld [vmem:[%s2130_s5 + $0x1c0] sm:$0xff]  ;;  %v2434_v2 = vld [vmem:[%s2130_s5 + $0x1c8] sm:$0xff] }
  0x8d   : > { %497 = vst [vmem:[%s2258_s7 + $0xb8] sm:$0xff] %v2225_v32  ;;  %498 = vst [vmem:[%s2258_s7 + $0xc0] sm:$0xff] %v2228_v33  ;;  %v2443_v3 = vld [vmem:[%s2130_s5 + $0x1d0] sm:$0xff]  ;;  %v2446_v4 = vld [vmem:[%s2130_s5 + $0x1d8] sm:$0xff] }
  0x8e   : > { %499 = vst [vmem:[%s2258_s7 + $0xc8] sm:$0xff] %v2231_v34  ;;  %500 = vst [vmem:[%s2258_s7 + $0xd0] sm:$0xff] %v2234_v35  ;;  %v2449_v5 = vld [vmem:[%s2130_s5 + $0x1e0] sm:$0xff]  ;;  %v2458_v6 = vld [vmem:[%s2130_s5 + $0x1e8] sm:$0xff] }
  0x8f   : > { %501 = vst [vmem:[%s2258_s7 + $0xd8] sm:$0xff] %v2237_v36  ;;  %502 = vst [vmem:[%s2258_s7 + $0xe0] sm:$0xff] %v2241_v37  ;;  %v2461_v7 = vld [vmem:[%s2130_s5 + $0x1f0] sm:$0xff]  ;;  %v2464_v8 = vld [vmem:[%s2130_s5 + $0x1f8] sm:$0xff] }
  0x90   : > { %503 = vst [vmem:[%s2258_s7 + $0xe8] sm:$0xff] %v2244_v38  ;;  %504 = vst [vmem:[%s2258_s7 + $0xf0] sm:$0xff] %v2247_v39 }
  0x91   : > { %474 = vst [vmem:[%s2258_s7] sm:$0xff] %v2156_v9  ;;  %3435 = vst [vmem:[#allocation54_spill] sm:$0xff] %v2323_v43 }
  0x92   : > { %3436 = vst [vmem:[#allocation55_spill] sm:$0xff] %v2326_v44  ;;  %3437 = vst [vmem:[#allocation56_spill] sm:$0xff] %v2329_v45 }
  0x93   : > { %505 = vst [vmem:[%s2258_s7 + $0xf8] sm:$0xff] %v2250_v40  ;;  %506 = vst [vmem:[%s2258_s7 + $0x100] sm:$0xff] %v2253_v41 }
  0x94   : > { %507 = vst [vmem:[%s2258_s7 + $0x108] sm:$0xff] %v2256_v42  ;;  %3438 = vst [vmem:[#allocation57_spill] sm:$0xff] %v2338_v46 }
  0x95   : > { %3439 = vst [vmem:[#allocation58_spill] sm:$0xff] %v2341_v47  ;;  %3440 = vst [vmem:[#allocation59_spill] sm:$0xff] %v2344_v48 }
  0x96   : > { %508 = vst [vmem:[%s2258_s7 + $0x110] sm:$0xff] %v2323_v43  ;;  %509 = vst [vmem:[%s2258_s7 + $0x118] sm:$0xff] %v2326_v44 }
  0x97   : > { %510 = vst [vmem:[%s2258_s7 + $0x120] sm:$0xff] %v2329_v45  ;;  %3441 = vst [vmem:[#allocation60_spill] sm:$0xff] %v2353_v49 }
  0x98   : > { %3442 = vst [vmem:[#allocation61_spill] sm:$0xff] %v2356_v50  ;;  %3443 = vst [vmem:[#allocation62_spill] sm:$0xff] %v2359_v51 }
  0x99   : > { %511 = vst [vmem:[%s2258_s7 + $0x128] sm:$0xff] %v2338_v46  ;;  %512 = vst [vmem:[%s2258_s7 + $0x130] sm:$0xff] %v2341_v47 }
  0x9a   : > { %513 = vst [vmem:[%s2258_s7 + $0x138] sm:$0xff] %v2344_v48  ;;  %3444 = vst [vmem:[#allocation63_spill] sm:$0xff] %v2368_v52 }
  0x9b   : > { %3445 = vst [vmem:[#allocation64_spill] sm:$0xff] %v2371_v53  ;;  %3446 = vst [vmem:[#allocation65_spill] sm:$0xff] %v2374_v54 }
  0x9c   : > { %514 = vst [vmem:[%s2258_s7 + $0x140] sm:$0xff] %v2353_v49  ;;  %515 = vst [vmem:[%s2258_s7 + $0x148] sm:$0xff] %v2356_v50 }
  0x9d   : > { %516 = vst [vmem:[%s2258_s7 + $0x150] sm:$0xff] %v2359_v51  ;;  %3447 = vst [vmem:[#allocation66_spill] sm:$0xff] %v2383_v55 }
  0x9e   : > { %3448 = vst [vmem:[#allocation67_spill] sm:$0xff] %v2386_v56  ;;  %3449 = vst [vmem:[#allocation68_spill] sm:$0xff] %v2389_v57 }
  0x9f   : > { %517 = vst [vmem:[%s2258_s7 + $0x158] sm:$0xff] %v2368_v52  ;;  %518 = vst [vmem:[%s2258_s7 + $0x160] sm:$0xff] %v2371_v53 }
  0xa0   : > { %519 = vst [vmem:[%s2258_s7 + $0x168] sm:$0xff] %v2374_v54  ;;  %3450 = vst [vmem:[#allocation69_spill] sm:$0xff] %v2398_v58 }
  0xa1   : > { %3451 = vst [vmem:[#allocation70_spill] sm:$0xff] %v2401_v59  ;;  %3452 = vst [vmem:[#allocation71_spill] sm:$0xff] %v2404_v60 }
  0xa2   : > { %520 = vst [vmem:[%s2258_s7 + $0x170] sm:$0xff] %v2383_v55  ;;  %521 = vst [vmem:[%s2258_s7 + $0x178] sm:$0xff] %v2386_v56 }
  0xa3   : > { %522 = vst [vmem:[%s2258_s7 + $0x180] sm:$0xff] %v2389_v57  ;;  %3453 = vst [vmem:[#allocation72_spill] sm:$0xff] %v2413_v61 }
  0xa4   : > { %3454 = vst [vmem:[#allocation73_spill] sm:$0xff] %v2416_v62  ;;  %3455 = vst [vmem:[#allocation74_spill] sm:$0xff] %v2419_v63 }
  0xa5   : > { %523 = vst [vmem:[%s2258_s7 + $0x188] sm:$0xff] %v2398_v58  ;;  %524 = vst [vmem:[%s2258_s7 + $0x190] sm:$0xff] %v2401_v59 }
  0xa6   : > { %525 = vst [vmem:[%s2258_s7 + $0x198] sm:$0xff] %v2404_v60  ;;  %3456 = vst [vmem:[#allocation75_spill] sm:$0xff] %v2428_v0 }
  0xa7   : > { %3457 = vst [vmem:[#allocation76_spill] sm:$0xff] %v2431_v1  ;;  %3458 = vst [vmem:[#allocation77_spill] sm:$0xff] %v2434_v2 }
  0xa8   : > { %526 = vst [vmem:[%s2258_s7 + $0x1a0] sm:$0xff] %v2413_v61  ;;  %527 = vst [vmem:[%s2258_s7 + $0x1a8] sm:$0xff] %v2416_v62 }
  0xa9   : > { %528 = vst [vmem:[%s2258_s7 + $0x1b0] sm:$0xff] %v2419_v63  ;;  %3459 = vst [vmem:[#allocation78_spill] sm:$0xff] %v2443_v3 }
  0xaa   : > { %3460 = vst [vmem:[#allocation79_spill] sm:$0xff] %v2446_v4  ;;  %3461 = vst [vmem:[#allocation80_spill] sm:$0xff] %v2449_v5 }
  0xab   : > { %529 = vst [vmem:[%s2258_s7 + $0x1b8] sm:$0xff] %v2428_v0  ;;  %530 = vst [vmem:[%s2258_s7 + $0x1c0] sm:$0xff] %v2431_v1  ;;  %v776_v1 = vlaneseq }
  0xac   : > { %531 = vst [vmem:[%s2258_s7 + $0x1c8] sm:$0xff] %v2434_v2  ;;  %3462 = vst [vmem:[#allocation81_spill] sm:$0xff] %v2458_v6 }
  0xad   : > { %3463 = vst [vmem:[#allocation82_spill] sm:$0xff] %v2461_v7  ;;  %3464 = vst [vmem:[#allocation83_spill] sm:$0xff] %v2464_v8  ;;  %v777_v2 = vshrl.u32 %v776_v1, 7 }
  0xae   : > { %532 = vst [vmem:[%s2258_s7 + $0x1d0] sm:$0xff] %v2443_v3  ;;  %533 = vst [vmem:[%s2258_s7 + $0x1d8] sm:$0xff] %v2446_v4 }
  0xaf   : > { %534 = vst [vmem:[%s2258_s7 + $0x1e0] sm:$0xff] %v2449_v5  ;;  %535 = vst [vmem:[%s2258_s7 + $0x1e8] sm:$0xff] %v2458_v6  ;;  %v2478_v63 = vsub.s32 0, %v777_v2 }
  0xb0   : > { %536 = vst [vmem:[%s2258_s7 + $0x1f0] sm:$0xff] %v2461_v7  ;;  %537 = vst [vmem:[%s2258_s7 + $0x1f8] sm:$0xff] %v2464_v8 }
  0xb1   : > { %3465 = vst [vmem:[#allocation84_spill] sm:$0xff] %v2478_v63 }
  0xf5   : > { %v545_v0 = vpop.permute.xlu0 %544 }
  0xf6   : > { %v2481_v62 = vmul.f32 %v545_v0, %v2156_v9  ;;  %v2484_v3 = vmul.f32 %v545_v0, %v2159_v10  ;;  %v2487_v4 = vmul.f32 %v545_v0, %v2162_v11  ;;  %v2490_v6 = vmul.f32 %v545_v0, %v2165_v12  ;;  %v555_v12 = vpop.permute.xlu1 %554 }
  0xf7   : > { %v2493_v7 = vmul.f32 %v545_v0, %v2168_v13  ;;  %v2496_v1 = vmul.f32 %v545_v0, %v2171_v14  ;;  %v2499_v2 = vmul.f32 %v545_v0, %v2174_v15  ;;  %v2502_v9 = vmul.f32 %v545_v0, %v2177_v16 }
  0xf8   : > { %v2505_v10 = vmul.f32 %v545_v0, %v2180_v17  ;;  %v2508_v11 = vmul.f32 %v545_v0, %v2183_v18  ;;  %v2511_v13 = vmul.f32 %v545_v0, %v2186_v19  ;;  %v2514_v14 = vmul.f32 %v545_v0, %v2189_v20 }
  0xf9   : > { %v550_v8 = vpop.permute.xlu0 %549  ;;  %v2517_v15 = vmul.f32 %v545_v0, %v2192_v21  ;;  %v2520_v16 = vmul.f32 %v545_v0, %v2195_v22  ;;  %v2523_v17 = vmul.f32 %v545_v0, %v2198_v23  ;;  %v2526_v18 = vmul.f32 %v545_v0, %v2201_v24 }
  0xfa   : > { %3466 = vst [vmem:[#allocation85_spill] sm:$0xff] %v2508_v11  ;;  %3467 = vst [vmem:[#allocation86_spill] sm:$0xff] %v2511_v13  ;;  %v578_v11 = vmul.f32 %v550_v8, %v2204_v25  ;;  %v579_v19 = vmul.f32 %v550_v8, %v2207_v26  ;;  %v580_v13 = vmul.f32 %v550_v8, %v2210_v27 }
  0xfb   : > { %3468 = vst [vmem:[#allocation87_spill] sm:$0xff] %v2517_v15  ;;  %3469 = vst [vmem:[#allocation88_spill] sm:$0xff] %v2523_v17  ;;  %v581_v20 = vmul.f32 %v550_v8, %v2213_v28  ;;  %v582_v21 = vmul.f32 %v550_v8, %v2216_v29  ;;  %v583_v15 = vmul.f32 %v550_v8, %v2219_v30  ;;  %v2564_v30 = vpop.permute.xlu1 %559 }
  0xfc   : > { %v584_v22 = vmul.f32 %v550_v8, %v2222_v31  ;;  %v585_v23 = vmul.f32 %v550_v8, %v2225_v32  ;;  %v2537_v17 = vmul.f32 %v550_v8, %v2228_v33  ;;  %v2540_v0 = vmul.f32 %v550_v8, %v2231_v34 }
  0xfd   : > { %v774_v24 = vpop.permute.xlu0 %773  ;;  %v2543_v26 = vmul.f32 %v550_v8, %v2234_v35  ;;  %v2546_v28 = vmul.f32 %v550_v8, %v2237_v36  ;;  %v2549_v29 = vmul.f32 %v550_v8, %v2241_v37  ;;  %v2552_v31 = vmul.f32 %v550_v8, %v2244_v38 }
  0xfe   : > { %v2555_v32 = vrot.slane %v774_v24, %v2478_v63  ;;  %v2558_v33 = vmul.f32 %v550_v8, %v2247_v39  ;;  %v2561_v34 = vmul.f32 %v550_v8, %v2250_v40  ;;  %v594_v35 = vmul.f32 %v555_v12, %v2253_v41  ;;  %v3476_v41 = vld [vmem:[#allocation76_spill] sm:$0xff] }
  0xff   : > { %v595_v36 = vmul.f32 %v555_v12, %v2256_v42  ;;  %v596_v37 = vmul.f32 %v555_v12, %v2323_v43  ;;  %v597_v38 = vmul.f32 %v555_v12, %v2326_v44  ;;  %v598_v27 = vmul.f32 %v555_v12, %v2329_v45  ;;  %v3475_v44 = vld [vmem:[#allocation75_spill] sm:$0xff] }
 0x100   : > { %3470 = vst [vmem:[#allocation89_spill] sm:$0xff] %v2555_v32  ;;  %v599_v24 = vmul.f32 %v555_v12, %v2338_v46  ;;  %v600_v39 = vmul.f32 %v555_v12, %v2341_v47  ;;  %v601_v25 = vmul.f32 %v555_v12, %v2344_v48  ;;  %v2574_v8 = vmul.f32 %v555_v12, %v2353_v49  ;;  %v3482_v32 = vld [vmem:[#allocation79_spill] sm:$0xff] }
 0x101   : > { %v2577_v40 = vmul.f32 %v555_v12, %v2356_v50  ;;  %v2580_v42 = vmul.f32 %v555_v12, %v2359_v51  ;;  %v2583_v43 = vmul.f32 %v555_v12, %v2368_v52  ;;  %v2586_v45 = vmul.f32 %v555_v12, %v2371_v53 }
 0x102   : > { %v2589_v46 = vmul.f32 %v555_v12, %v2374_v54  ;;  %v2592_v48 = vmul.f32 %v555_v12, %v2383_v55  ;;  %v2595_v49 = vmul.f32 %v555_v12, %v2386_v56  ;;  %v610_v50 = vmul.f32 %v2564_v30, %v2389_v57  ;;  %v3473_v55 = vld [vmem:[#allocation73_spill] sm:$0xff]  ;;  %v3474_v12 = vld [vmem:[#allocation74_spill] sm:$0xff] }
 0x103   : > { %v611_v51 = vmul.f32 %v2564_v30, %v2398_v58  ;;  %v612_v52 = vmul.f32 %v2564_v30, %v2401_v59  ;;  %v613_v53 = vmul.f32 %v2564_v30, %v2404_v60  ;;  %v614_v54 = vmul.f32 %v2564_v30, %v2413_v61  ;;  %v3478_v59 = vld [vmem:[#allocation77_spill] sm:$0xff]  ;;  %v3480_v60 = vld [vmem:[#allocation78_spill] sm:$0xff] }
 0x104   : > { %3471 = vst [vmem:[#allocation90_spill] sm:$0xff] %v2592_v48  ;;  %3472 = vst [vmem:[#allocation91_spill] sm:$0xff] %v2595_v49  ;;  %v615_v47 = vmul.f32 %v2564_v30, %v3473_v55  ;;  %v616_v56 = vmul.f32 %v2564_v30, %v3474_v12  ;;  %v617_v57 = vmul.f32 %v2564_v30, %v3475_v44  ;;  %v3485_v44 = vld [vmem:[#allocation81_spill] sm:$0xff] }
 0x105   : > { %v2615_v58 = vmul.f32 %v2564_v30, %v3476_v41  ;;  %v2619_v63 = vmul.f32 %v2564_v30, %v3478_v59  ;;  %v2623_v61 = vmul.f32 %v2564_v30, %v3480_v60  ;;  %v2627_v55 = vmul.f32 %v2564_v30, %v3482_v32 }
 0x106   : > { %v2631_v12 = vmul.f32 %v2564_v30, %v2449_v5  ;;  %v2635_v41 = vmul.f32 %v2564_v30, %v3485_v44  ;;  %v626_v49 = vadd.f32 %v578_v11, %v2481_v62  ;;  %v635_v59 = vadd.f32 %v579_v19, %v2484_v3 }
 0x107   : > { %3477 = vst [vmem:[#allocation92_spill] sm:$0xff] %v2615_v58  ;;  %3479 = vst [vmem:[#allocation93_spill] sm:$0xff] %v2619_v63  ;;  %v644_v63 = vadd.f32 %v580_v13, %v2487_v4  ;;  %v653_v60 = vadd.f32 %v581_v20, %v2490_v6  ;;  %v671_v32 = vadd.f32 %v583_v15, %v2496_v1 }
 0x108   : > { %3481 = vst [vmem:[#allocation94_spill] sm:$0xff] %v2623_v61  ;;  %3483 = vst [vmem:[#allocation95_spill] sm:$0xff] %v2627_v55  ;;  %v662_v61 = vadd.f32 %v582_v21, %v2493_v7  ;;  %v680_v55 = vadd.f32 %v584_v22, %v2499_v2  ;;  %v627_v5 = vadd.f32 %v626_v49, %v594_v35 }
 0x109   : > { %3484 = vst [vmem:[#allocation96_spill] sm:$0xff] %v2631_v12  ;;  %3486 = vst [vmem:[#allocation97_spill] sm:$0xff] %v2635_v41  ;;  %v636_v12 = vadd.f32 %v635_v59, %v595_v36  ;;  %v645_v58 = vadd.f32 %v644_v63, %v596_v37  ;;  %v689_v44 = vadd.f32 %v585_v23, %v2502_v9 }
 0x10a   : > { %v654_v41 = vadd.f32 %v653_v60, %v597_v38  ;;  %v663_v48 = vadd.f32 %v662_v61, %v598_v27  ;;  %v672_v11 = vadd.f32 %v671_v32, %v599_v24  ;;  %v681_v62 = vadd.f32 %v680_v55, %v600_v39 }
 0x10b   : > { %v628_v19 = vadd.f32 %v627_v5, %v610_v50  ;;  %v637_v3 = vadd.f32 %v636_v12, %v611_v51  ;;  %v646_v13 = vadd.f32 %v645_v58, %v612_v52  ;;  %v690_v4 = vadd.f32 %v689_v44, %v601_v25 }
 0x10c   : > { %v655_v20 = vadd.f32 %v654_v41, %v613_v53  ;;  %v664_v6 = vadd.f32 %v663_v48, %v614_v54  ;;  %v673_v21 = vadd.f32 %v672_v11, %v615_v47  ;;  %v682_v7 = vadd.f32 %v681_v62, %v616_v56  ;;  %v3487_v62 = vld [vmem:[#allocation82_spill] sm:$0xff] }
 0x10d   : > { %v629_v15 = vrot.slane %v628_v19, 4  ;;  %v638_v1 = vrot.slane %v637_v3, 4  ;;  %v647_v22 = vrot.slane %v646_v13, 4  ;;  %v691_v35 = vadd.f32 %v690_v4, %v617_v57 }
 0x10e   : > { %v656_v36 = vrot.slane %v655_v20, 4  ;;  %v665_v37 = vrot.slane %v664_v6, 4  ;;  %v674_v49 = vrot.slane %v673_v21, 4  ;;  %v683_v9 = vrot.slane %v682_v7, 4 }
 0x10f   : > { %v630_v23 = vadd.f32 %v629_v15, %v628_v19  ;;  %v639_v27 = vadd.f32 %v638_v1, %v637_v3  ;;  %v648_v32 = vadd.f32 %v647_v22, %v646_v13  ;;  %v692_v38 = vrot.slane %v691_v35, 4 }
 0x110   : > { %v657_v39 = vadd.f32 %v656_v36, %v655_v20  ;;  %v666_v50 = vadd.f32 %v665_v37, %v664_v6  ;;  %v675_v51 = vadd.f32 %v674_v49, %v673_v21  ;;  %v684_v25 = vadd.f32 %v683_v9, %v682_v7  ;;  %v3488_v20 = vld [vmem:[#allocation83_spill] sm:$0xff] }
 0x111   : > { %v631_v41 = vrot.slane %v630_v23, 2  ;;  %v640_v44 = vrot.slane %v639_v27, 2  ;;  %v649_v47 = vrot.slane %v648_v32, 2  ;;  %v693_v48 = vadd.f32 %v692_v38, %v691_v35  ;;  %v3491_v38 = vld [vmem:[#allocation87_spill] sm:$0xff] }
 0x112   : > { %v658_v52 = vrot.slane %v657_v39, 2  ;;  %v667_v53 = vrot.slane %v666_v50, 2  ;;  %v676_v54 = vrot.slane %v675_v51, 2  ;;  %v685_v55 = vrot.slane %v684_v25, 2 }
 0x113   : > { %v632_v56 = vadd.f32 %v631_v41, %v630_v23  ;;  %v641_v57 = vadd.f32 %v640_v44, %v639_v27  ;;  %v650_v58 = vadd.f32 %v649_v47, %v648_v32  ;;  %v694_v59 = vrot.slane %v693_v48, 2  ;;  %v3490_v23 = vld [vmem:[#allocation86_spill] sm:$0xff] }
 0x114   : > { %v659_v60 = vadd.f32 %v658_v52, %v657_v39  ;;  %v668_v61 = vadd.f32 %v667_v53, %v666_v50  ;;  %v677_v63 = vadd.f32 %v676_v54, %v675_v51  ;;  %v2645_v5 = vadd.f32 %v685_v55, %v684_v25  ;;  %v3492_v51 = vld [vmem:[#allocation88_spill] sm:$0xff]  ;;  %v3493_v41 = vld [vmem:[#allocation90_spill] sm:$0xff] }
 0x115   : > { %v633_v2 = vrot.slane %v632_v56, 1  ;;  %v642_v24 = vrot.slane %v641_v57, 1  ;;  %v651_v12 = vrot.slane %v650_v58, 1  ;;  %v2647_v11 = vadd.f32 %v694_v59, %v693_v48  ;;  %v3499_v54 = vld [vmem:[#allocation96_spill] sm:$0xff] }
 0x116   : > { %v624_v19 = vmul.f32 %v2564_v30, %v3487_v62  ;;  %v660_v3 = vrot.slane %v659_v60, 1  ;;  %v669_v13 = vrot.slane %v668_v61, 1  ;;  %v678_v4 = vrot.slane %v677_v63, 1 }
 0x117   : > { %v625_v6 = vmul.f32 %v2564_v30, %v3488_v20  ;;  %v2653_v21 = vadd.f32 %v633_v2, %v632_v56  ;;  %v2655_v7 = vadd.f32 %v642_v24, %v641_v57  ;;  %v687_v15 = vrot.slane %v2645_v5, 1  ;;  %v3489_v30 = vld [vmem:[#allocation85_spill] sm:$0xff] }
 0x118   : > { %v2658_v1 = vadd.f32 %v651_v12, %v650_v58  ;;  %v2660_v22 = vadd.f32 %v660_v3, %v659_v60  ;;  %v2662_v35 = vadd.f32 %v669_v13, %v668_v61  ;;  %v696_v36 = vrot.slane %v2647_v11, 1 }
 0x119   : > { %v2665_v37 = vadd.f32 %v678_v4, %v677_v63  ;;  %v698_v49 = vadd.f32 %v2537_v17, %v2505_v10  ;;  %v707_v9 = vadd.f32 %v2540_v0, %v3489_v30  ;;  %v716_v27 = vadd.f32 %v2543_v26, %v3490_v23 }
 0x11a   : > { %v725_v32 = vadd.f32 %v2546_v28, %v2514_v14  ;;  %v734_v39 = vadd.f32 %v2549_v29, %v3491_v38  ;;  %v743_v50 = vadd.f32 %v2552_v31, %v2520_v16  ;;  %v752_v25 = vadd.f32 %v2558_v33, %v3492_v51  ;;  %v3494_v31 = vld [vmem:[#allocation92_spill] sm:$0xff]  ;;  %v3495_v33 = vld [vmem:[#allocation93_spill] sm:$0xff] }
 0x11b   : > { %v699_v10 = vadd.f32 %v698_v49, %v2574_v8  ;;  %v708_v17 = vadd.f32 %v707_v9, %v2577_v40  ;;  %v717_v0 = vadd.f32 %v716_v27, %v2580_v42  ;;  %v761_v26 = vadd.f32 %v2561_v34, %v2526_v18  ;;  %v3496_v8 = vld [vmem:[#allocation94_spill] sm:$0xff]  ;;  %v3497_v40 = vld [vmem:[#allocation91_spill] sm:$0xff]  ;;  %v3500_v34 = vld [vmem:[#allocation97_spill] sm:$0xff] }
 0x11c   : > { %v726_v14 = vadd.f32 %v725_v32, %v2583_v43  ;;  %v735_v28 = vadd.f32 %v734_v39, %v2586_v45  ;;  %v744_v29 = vadd.f32 %v743_v50, %v2589_v46  ;;  %v753_v16 = vadd.f32 %v752_v25, %v3493_v41  ;;  %v3498_v42 = vld [vmem:[#allocation95_spill] sm:$0xff] }
 0x11d   : > { %v700_v44 = vadd.f32 %v699_v10, %v3494_v31  ;;  %v709_v47 = vadd.f32 %v708_v17, %v3495_v33  ;;  %v718_v48 = vadd.f32 %v717_v0, %v3496_v8  ;;  %v762_v52 = vadd.f32 %v761_v26, %v3497_v40 }
 0x11e   : > { %v727_v53 = vadd.f32 %v726_v14, %v3498_v42  ;;  %v736_v18 = vadd.f32 %v735_v28, %v3499_v54  ;;  %v745_v43 = vadd.f32 %v744_v29, %v3500_v34  ;;  %v754_v55 = vadd.f32 %v753_v16, %v624_v19  ;;  %v3501_v34 = vld [vmem:[#allocation89_spill] sm:$0xff] }
 0x11f   : > { %v701_v45 = vrot.slane %v700_v44, 4  ;;  %v710_v56 = vrot.slane %v709_v47, 4  ;;  %v719_v46 = vrot.slane %v718_v48, 4  ;;  %v763_v57 = vadd.f32 %v762_v52, %v625_v6 }
 0x120   : > { %v728_v58 = vrot.slane %v727_v53, 4  ;;  %v737_v59 = vrot.slane %v736_v18, 4  ;;  %v746_v60 = vrot.slane %v745_v43, 4  ;;  %v755_v61 = vrot.slane %v754_v55, 4 }
 0x121   : > { %v702_v63 = vadd.f32 %v701_v45, %v700_v44  ;;  %v711_v2 = vadd.f32 %v710_v56, %v709_v47  ;;  %v720_v24 = vadd.f32 %v719_v46, %v718_v48  ;;  %v764_v12 = vrot.slane %v763_v57, 4 }
 0x122   : > { %v729_v3 = vadd.f32 %v728_v58, %v727_v53  ;;  %v738_v13 = vadd.f32 %v737_v59, %v736_v18  ;;  %v747_v4 = vadd.f32 %v746_v60, %v745_v43  ;;  %v756_v49 = vadd.f32 %v755_v61, %v754_v55 }
 0x123   : > { %v703_v30 = vrot.slane %v702_v63, 2  ;;  %v712_v9 = vrot.slane %v711_v2, 2  ;;  %v721_v23 = vrot.slane %v720_v24, 2  ;;  %v765_v19 = vadd.f32 %v764_v12, %v763_v57 }
 0x124   : > { %v730_v27 = vrot.slane %v729_v3, 2  ;;  %v739_v32 = vrot.slane %v738_v13, 2  ;;  %v748_v38 = vrot.slane %v747_v4, 2  ;;  %v757_v6 = vrot.slane %v756_v49, 2 }
 0x125   : > { %v704_v39 = vadd.f32 %v703_v30, %v702_v63  ;;  %v713_v50 = vadd.f32 %v712_v9, %v711_v2  ;;  %v722_v51 = vadd.f32 %v721_v23, %v720_v24  ;;  %v766_v25 = vrot.slane %v765_v19, 2 }
 0x126   : > { %v731_v10 = vadd.f32 %v730_v27, %v729_v3  ;;  %v740_v17 = vadd.f32 %v739_v32, %v738_v13  ;;  %v749_v0 = vadd.f32 %v748_v38, %v747_v4  ;;  %v758_v26 = vadd.f32 %v757_v6, %v756_v49  ;;  %v2746_v32 = vld [vmem:[#allocation2] sm:$0x1] }
 0x127   : > { %v705_v14 = vrot.slane %v704_v39, 1  ;;  %v714_v28 = vrot.slane %v713_v50, 1  ;;  %v723_v29 = vrot.slane %v722_v51, 1  ;;  %v767_v41 = vadd.f32 %v766_v25, %v765_v19 }
 0x128   : > { %v688_v16 = vadd.f32 %v687_v15, %v2645_v5  ;;  %v732_v31 = vrot.slane %v731_v10, 1  ;;  %v741_v44 = vrot.slane %v740_v17, 1  ;;  %v750_v33 = vrot.slane %v749_v0, 1 }
 0x129   : > { %v697_v47 = vadd.f32 %v696_v36, %v2647_v11  ;;  %v706_v8 = vadd.f32 %v705_v14, %v704_v39  ;;  %v715_v48 = vadd.f32 %v714_v28, %v713_v50  ;;  %v759_v40 = vrot.slane %v758_v26, 1 }
 0x12a   : > { %v724_v52 = vadd.f32 %v723_v29, %v722_v51  ;;  %v733_v42 = vadd.f32 %v732_v31, %v731_v10  ;;  %v742_v53 = vadd.f32 %v741_v44, %v740_v17  ;;  %v768_v54 = vrot.slane %v767_v41, 1  ;;  %v3502_v51 = vld [vmem:[#allocation84_spill] sm:$0xff] }
 0x12b   : > { %v751_v18 = vadd.f32 %v750_v33, %v749_v0  ;;  %v780_v43 = vadd.f32 %v3501_v34, %v2653_v21  ;;  %v781_v5 = vadd.f32 %v3501_v34, %v2655_v7  ;;  %v782_v15 = vadd.f32 %v3501_v34, %v2658_v1 }
 0x12c   : > { %v783_v11 = vadd.f32 %v3501_v34, %v2660_v22  ;;  %v784_v36 = vadd.f32 %v3501_v34, %v2662_v35  ;;  %v785_v55 = vadd.f32 %v3501_v34, %v2665_v37  ;;  %v786_v45 = vadd.f32 %v3501_v34, %v688_v16 }
 0x12d   : > { %v760_v56 = vadd.f32 %v759_v40, %v758_v26  ;;  %v787_v21 = vadd.f32 %v3501_v34, %v697_v47  ;;  %v769_v46 = vadd.f32 %v768_v54, %v767_v41  ;;  %v788_v7 = vadd.f32 %v3501_v34, %v706_v8 }
 0x12e   : > { %v2719_v57 = vadd.f32 %v3501_v34, %v715_v48  ;;  %v2722_v1 = vadd.f32 %v3501_v34, %v724_v52  ;;  %v797_v22 = vmax.f32 %v780_v43, %v784_v36  ;;  %v798_v58 = vmax.f32 %v781_v5, %v785_v55 }
 0x12f   : > { %v799_v35 = vmax.f32 %v782_v15, %v786_v45  ;;  %v2725_v59 = vadd.f32 %v3501_v34, %v733_v42  ;;  %v2728_v37 = vadd.f32 %v3501_v34, %v742_v53  ;;  %v2731_v60 = vadd.f32 %v3501_v34, %v751_v18 }
 0x130   : > { %v800_v61 = vmax.f32 %v783_v11, %v787_v21  ;;  %v2734_v63 = vadd.f32 %v3501_v34, %v760_v56  ;;  %v801_v2 = vmax.f32 %v797_v22, %v788_v7  ;;  %v802_v24 = vmax.f32 %v798_v58, %v2719_v57  ;;  %v3504_v56 = vld [vmem:[#allocation21_spill] sm:$0xff] }
 0x131   : > { %v803_v12 = vmax.f32 %v799_v35, %v2722_v1  ;;  %v2739_v3 = vadd.f32 %v3501_v34, %v769_v46  ;;  %v3506_v22 = vld [vmem:[#allocation37_spill] sm:$0xff] }
 0x132   : > { %v804_v13 = vmax.f32 %v800_v61, %v2725_v59  ;;  %v805_v4 = vmax.f32 %v801_v2, %v2728_v37  ;;  %v806_v49 = vmax.f32 %v802_v24, %v2731_v60 }
 0x133   : > { %v807_v30 = vmax.f32 %v803_v12, %v2734_v63 }
 0x134   : > { %v808_v9 = vmax.f32 %v804_v13, %v2739_v3  ;;  %v809_v23 = vmax.f32 %v805_v4, %v806_v49  ;;  %v3508_v49 = vld [vmem:[#allocation23_spill] sm:$0xff] }
 0x136   : > { %v810_v19 = vmax.f32 %v807_v30, %v808_v9 }
 0x138   : > { %v811_v27 = vmax.f32 %v809_v23, %v810_v19 }
 0x13a   : > { %812 = vmax.xlane.f32.xlu1 %v811_v27  ;;  %v3509_v27 = vld [vmem:[#allocation38_spill] sm:$0xff] }
 0x1c7   : > { %v813_v38 = vpop.xlane.xlu1 %812 }
 0x1c8   : > { %v2749_v6 = vmax.f32 %v2746_v32, %v813_v38 }
 0x1ca   : > { %v815_v39 = vsub.f32 %v2746_v32, %v2749_v6  ;;  %1052 = vst.msk [vmem:[#allocation2] sm:$0x1] %vm895_vm2, %v2749_v6  ;;  %820 = vperm.xlu0 %1670, %v2749_v6  }
 0x249   : > { %v821_v50 = vpop.permute.xlu0 %820 }
 0x24a   : > { %v2757_v25 = vrot.slane %v821_v50, %v3502_v51 }
 0x24c   : > { %v827_v10 = vsub.f32 %v780_v43, %v2757_v25  ;;  %v828_v17 = vsub.f32 %v781_v5, %v2757_v25  ;;  %v829_v0 = vsub.f32 %v782_v15, %v2757_v25  ;;  %v830_v26 = vsub.f32 %v783_v11, %v2757_v25  ;;  %v3503_v15 = vld [vmem:[#allocation20_spill] sm:$0xff] }
 0x24d   : > { %v831_v14 = vsub.f32 %v784_v36, %v2757_v25  ;;  %v832_v16 = vsub.f32 %v785_v55, %v2757_v25  ;;  %v833_v44 = vsub.f32 %v786_v45, %v2757_v25  ;;  %v834_v47 = vsub.f32 %v787_v21, %v2757_v25 }
 0x24e   : > { %v843_v28 = vmul.f32 1.442695, %v827_v10  ;;  %v845_v29 = vmul.f32 1.442695, %v828_v17  ;;  %v847_v41 = vmul.f32 1.442695, %v829_v0  ;;  %v835_v48 = vsub.f32 %v788_v7, %v2757_v25 }
 0x24f   : > { %v849_v31 = vmul.f32 1.442695, %v830_v26  ;;  %v851_v33 = vmul.f32 1.442695, %v831_v14  ;;  %v853_v8 = vmul.f32 1.442695, %v832_v16  ;;  %v836_v52 = vsub.f32 %v2719_v57, %v2757_v25 }
 0x250   : > { %1672 = vpow2.f32 %v843_v28  ;;  %v855_v40 = vmul.f32 1.442695, %v833_v44  ;;  %v857_v42 = vmul.f32 1.442695, %v834_v47  ;;  %v837_v53 = vsub.f32 %v2722_v1, %v2757_v25  ;;  %v3505_v57 = vld [vmem:[#allocation36_spill] sm:$0xff]  ;;  %v3511_v28 = vld [vmem:[#allocation39_spill] sm:$0xff] }
 0x251   : > { %1674 = vpow2.f32 %v845_v29  ;;  %v859_v54 = vmul.f32 1.442695, %v835_v48  ;;  %v838_v43 = vsub.f32 %v2725_v59, %v2757_v25  ;;  %v861_v5 = vmul.f32 1.442695, %v836_v52  ;;  %v3507_v59 = vld [vmem:[#allocation22_spill] sm:$0xff]  ;;  %v3512_v44 = vld [vmem:[#allocation25_spill] sm:$0xff] }
 0x252   : > { %1676 = vpow2.f32 %v847_v41  ;;  %v839_v55 = vsub.f32 %v2728_v37, %v2757_v25  ;;  %v863_v7 = vmul.f32 1.442695, %v837_v53  ;;  %v840_v24 = vsub.f32 %v2731_v60, %v2757_v25  ;;  %v3513_v47 = vld [vmem:[#allocation40_spill] sm:$0xff] }
 0x253   : > { %1678 = vpow2.f32 %v849_v31  ;;  %v865_v12 = vmul.f32 1.442695, %v838_v43  ;;  %v841_v13 = vsub.f32 %v2734_v63, %v2757_v25  ;;  %v842_v60 = vsub.f32 %v2739_v3, %v2757_v25  ;;  %v3510_v63 = vld [vmem:[#allocation24_spill] sm:$0xff] }
 0x254   : > { %1680 = vpow2.f32 %v851_v33  ;;  %v867_v19 = vmul.f32 1.442695, %v839_v55  ;;  %v869_v14 = vmul.f32 1.442695, %v840_v24  ;;  %v3520_v24 = vld [vmem:[#allocation28_spill] sm:$0xff] }
 0x255   : > { %1682 = vpow2.f32 %v853_v8  ;;  %v871_v16 = vmul.f32 1.442695, %v841_v13 }
 0x256   : > { %1684 = vpow2.f32 %v855_v40  ;;  %v873_v40 = vmul.f32 1.442695, %v842_v60 }
 0x257   : > { %1686 = vpow2.f32 %v857_v42  ;;  %v3514_v42 = vld [vmem:[#allocation26_spill] sm:$0xff] }
 0x258   : > { %1688 = vpow2.f32 %v859_v54 }
 0x259   : > { %1690 = vpow2.f32 %v861_v5  ;;  %v3515_v5 = vld [vmem:[#allocation41_spill] sm:$0xff] }
 0x25a   : > { %v2772_v18 = vpop.eup %1672  ;;  %1692 = vpow2.f32 %v863_v7 }
 0x25b   : > { %v2774_v34 = vpop.eup %1674  ;;  %v911_v11 = vmul.f32 %v2772_v18, %v3503_v15  ;;  %v927_v1 = vmul.f32 %v2772_v18, %v3505_v57  ;;  %1694 = vpow2.f32 %v865_v12  ;;  %v3517_v57 = vld [vmem:[#allocation42_spill] sm:$0xff] }
 0x25c   : > { %v2780_v36 = vpop.eup %1676  ;;  %v877_v45 = vadd.f32 %v2774_v34, %v2772_v18  ;;  %v912_v21 = vmul.f32 %v2774_v34, %v3504_v56  ;;  %v928_v58 = vmul.f32 %v2774_v34, %v3506_v22  ;;  %1696 = vpow2.f32 %v867_v19 }
 0x25d   : > { %v2788_v46 = vpop.eup %1678  ;;  %v913_v37 = vmul.f32 %v2780_v36, %v3507_v59  ;;  %v929_v38 = vmul.f32 %v2780_v36, %v3509_v27  ;;  %1698 = vpow2.f32 %v869_v14  ;;  %v3519_v59 = vld [vmem:[#allocation53_spill] sm:$0xff] }
 0x25e   : > { %v878_v35 = vadd.f32 %v2780_v36, %v877_v45  ;;  %v975_v61 = vadd.f32 %v912_v21, %v911_v11  ;;  %v2797_v2 = vpop.eup %1680  ;;  %v914_v30 = vmul.f32 %v2788_v46, %v3508_v49  ;;  %v992_v50 = vadd.f32 %v928_v58, %v927_v1  ;;  %v3516_v45 = vld [vmem:[#allocation27_spill] sm:$0xff]  ;;  %v3518_v58 = vld [vmem:[#allocation52_spill] sm:$0xff]  ;;  %v3522_v27 = vld [vmem:[#allocation29_spill] sm:$0xff] }
 0x25f   : > { %v2806_v23 = vpop.eup %1682  ;;  %v915_v17 = vmul.f32 %v2797_v2, %v3510_v63  ;;  %v930_v29 = vmul.f32 %v2788_v46, %v3511_v28  ;;  %v931_v8 = vmul.f32 %v2797_v2, %v3513_v47  ;;  %1700 = vpow2.f32 %v871_v16  ;;  %v3521_v49 = vld [vmem:[#allocation43_spill] sm:$0xff] }
 0x260   : > { %v879_v4 = vadd.f32 %v2788_v46, %v878_v35  ;;  %v976_v9 = vadd.f32 %v975_v61, %v913_v37  ;;  %v2815_v26 = vpop.eup %1684  ;;  %v993_v41 = vadd.f32 %v992_v50, %v929_v38  ;;  %v916_v3 = vmul.f32 %v2806_v23, %v3512_v44 }
 0x261   : > { %v2822_v33 = vpop.eup %1686  ;;  %v917_v53 = vmul.f32 %v2815_v26, %v3514_v42  ;;  %v932_v15 = vmul.f32 %v2806_v23, %v3515_v5  ;;  %v933_v1 = vmul.f32 %v2815_v26, %v3517_v57  ;;  %v943_v35 = vmul.f32 %v2772_v18, %v3518_v58  ;;  %v3532_v58 = vld [vmem:[#allocation32_spill] sm:$0xff] }
 0x262   : > { %v880_v10 = vadd.f32 %v2797_v2, %v879_v4  ;;  %v977_v0 = vadd.f32 %v976_v9, %v914_v30  ;;  %v994_v48 = vadd.f32 %v993_v41, %v930_v29  ;;  %v2829_v43 = vpop.eup %1688  ;;  %v918_v56 = vmul.f32 %v2822_v33, %v3516_v45  ;;  %v3525_v29 = vld [vmem:[#allocation30_spill] sm:$0xff] }
 0x263   : > { %v2836_v7 = vpop.eup %1690  ;;  %v944_v37 = vmul.f32 %v2774_v34, %v3519_v59  ;;  %1702 = vpow2.f32 %v873_v40  ;;  %v919_v12 = vmul.f32 %v2829_v43, %v3520_v24  ;;  %v934_v30 = vmul.f32 %v2822_v33, %v3521_v49  ;;  %v3533_v24 = vld [vmem:[#allocation57_spill] sm:$0xff] }
 0x264   : > { %v881_v31 = vadd.f32 %v2806_v23, %v880_v10  ;;  %v978_v25 = vadd.f32 %v977_v0, %v915_v17  ;;  %v995_v11 = vadd.f32 %v994_v48, %v931_v8  ;;  %v2847_v4 = vpop.eup %1692  ;;  %v920_v38 = vmul.f32 %v2836_v7, %v3522_v27  ;;  %v3523_v10 = vld [vmem:[#allocation44_spill] sm:$0xff]  ;;  %v3524_v0 = vld [vmem:[#allocation54_spill] sm:$0xff]  ;;  %v3527_v8 = vld [vmem:[#allocation55_spill] sm:$0xff] }
 0x265   : > { %v2854_v60 = vpop.eup %1694  ;;  %v935_v63 = vmul.f32 %v2829_v43, %v3523_v10  ;;  %v945_v14 = vmul.f32 %v2780_v36, %v3524_v0  ;;  %v921_v41 = vmul.f32 %v2847_v4, %v3525_v29  ;;  %v946_v48 = vmul.f32 %v2788_v46, %v3527_v8  ;;  %v3539_v29 = vld [vmem:[#allocation49_spill] sm:$0xff] }
 0x266   : > { %v882_v52 = vadd.f32 %v2815_v26, %v881_v31  ;;  %v979_v54 = vadd.f32 %v978_v25, %v916_v3  ;;  %v996_v22 = vadd.f32 %v995_v11, %v932_v15  ;;  %v1009_v31 = vadd.f32 %v944_v37, %v943_v35  ;;  %v2863_v44 = vpop.eup %1696  ;;  %v3526_v3 = vld [vmem:[#allocation45_spill] sm:$0xff]  ;;  %v3529_v15 = vld [vmem:[#allocation46_spill] sm:$0xff] }
 0x267   : > { %v936_v25 = vmul.f32 %v2836_v7, %v3526_v3  ;;  %v2872_v5 = vpop.eup %1698  ;;  %v937_v11 = vmul.f32 %v2847_v4, %v3529_v15  ;;  %v923_v35 = vmul.f32 %v2863_v44, %v3532_v58  ;;  %v3543_v15 = vld [vmem:[#allocation59_spill] sm:$0xff] }
 0x268   : > { %v883_v55 = vadd.f32 %v2822_v33, %v882_v52  ;;  %v980_v21 = vadd.f32 %v979_v54, %v917_v53  ;;  %v997_v9 = vadd.f32 %v996_v22, %v933_v1  ;;  %v3528_v52 = vld [vmem:[#allocation31_spill] sm:$0xff]  ;;  %v1010_v54 = vadd.f32 %v1009_v31, %v945_v14  ;;  %v3538_v14 = vld [vmem:[#allocation48_spill] sm:$0xff]  ;;  %v3540_v31 = vld [vmem:[#allocation58_spill] sm:$0xff] }
 0x269   : > { %v922_v42 = vmul.f32 %v2854_v60, %v3528_v52  ;;  %v2880_v1 = vpop.eup %1700  ;;  %v949_v3 = vmul.f32 %v2815_v26, %v3540_v31 }
 0x26a   : > { %v884_v61 = vadd.f32 %v2829_v43, %v883_v55  ;;  %v981_v13 = vadd.f32 %v980_v21, %v918_v56  ;;  %v998_v17 = vadd.f32 %v997_v9, %v934_v30  ;;  %v3530_v55 = vld [vmem:[#allocation47_spill] sm:$0xff]  ;;  %v3531_v21 = vld [vmem:[#allocation56_spill] sm:$0xff]  ;;  %v1011_v37 = vadd.f32 %v1010_v54, %v946_v48  ;;  %v3535_v30 = vld [vmem:[#allocation69_spill] sm:$0xff] }
 0x26b   : > { %v938_v45 = vmul.f32 %v2854_v60, %v3530_v55  ;;  %v947_v57 = vmul.f32 %v2797_v2, %v3531_v21  ;;  %v960_v9 = vmul.f32 %v2774_v34, %v3535_v30 }
 0x26c   : > { %v885_v19 = vadd.f32 %v2836_v7, %v884_v61  ;;  %v982_v50 = vadd.f32 %v981_v13, %v919_v12  ;;  %v999_v47 = vadd.f32 %v998_v17, %v935_v63  ;;  %v948_v12 = vmul.f32 %v2806_v23, %v3533_v24  ;;  %v3534_v13 = vld [vmem:[#allocation68_spill] sm:$0xff]  ;;  %v3537_v17 = vld [vmem:[#allocation34_spill] sm:$0xff] }
 0x26d   : > { %v959_v49 = vmul.f32 %v2772_v18, %v3534_v13  ;;  %v1012_v63 = vadd.f32 %v1011_v37, %v947_v57  ;;  %v925_v0 = vmul.f32 %v2880_v1, %v3537_v17  ;;  %v940_v18 = vmul.f32 %v2872_v5, %v3539_v29  ;;  %v3545_v57 = vld [vmem:[#allocation71_spill] sm:$0xff]  ;;  %v3548_v13 = vld [vmem:[#allocation72_spill] sm:$0xff]  ;;  %v3551_v17 = vld [vmem:[#allocation62_spill] sm:$0xff] }
 0x26e   : > { %v886_v28 = vadd.f32 %v2847_v4, %v885_v19  ;;  %v983_v16 = vadd.f32 %v982_v50, %v920_v38  ;;  %v1000_v56 = vadd.f32 %v999_v47, %v936_v25  ;;  %v2891_v19 = vpop.eup %1702  ;;  %v3536_v38 = vld [vmem:[#allocation33_spill] sm:$0xff]  ;;  %v3541_v47 = vld [vmem:[#allocation35_spill] sm:$0xff] }
 0x26f   : > { %v924_v50 = vmul.f32 %v2872_v5, %v3536_v38  ;;  %v1013_v25 = vadd.f32 %v1012_v63, %v948_v12  ;;  %v926_v8 = vmul.f32 %v2891_v19, %v3541_v47 }
 0x270   : > { %v887_v40 = vadd.f32 %v2854_v60, %v886_v28  ;;  %v984_v53 = vadd.f32 %v983_v16, %v921_v41  ;;  %v1001_v61 = vadd.f32 %v1000_v56, %v937_v11  ;;  %v939_v28 = vmul.f32 %v2863_v44, %v3538_v14 }
 0x271   : > { %v950_v11 = vmul.f32 %v2822_v33, %v3543_v15  ;;  %v1014_v55 = vadd.f32 %v1013_v25, %v949_v3  ;;  %v3555_v25 = vld [vmem:[#allocation64_spill] sm:$0xff] }
 0x272   : > { %v888_v22 = vadd.f32 %v2863_v44, %v887_v40  ;;  %v985_v59 = vadd.f32 %v984_v53, %v922_v42  ;;  %v1002_v41 = vadd.f32 %v1001_v61, %v938_v45  ;;  %v3542_v40 = vld [vmem:[#allocation70_spill] sm:$0xff]  ;;  %v1026_v42 = vadd.f32 %v960_v9, %v959_v49  ;;  %v3547_v61 = vld [vmem:[#allocation51_spill] sm:$0xff]  ;;  %v3549_v9 = vld [vmem:[#allocation61_spill] sm:$0xff] }
 0x273   : > { %v961_v52 = vmul.f32 %v2780_v36, %v3542_v40  ;;  %v3544_v45 = vld [vmem:[#allocation50_spill] sm:$0xff]  ;;  %v1015_v37 = vadd.f32 %v1014_v55, %v950_v11  ;;  %v942_v24 = vmul.f32 %v2891_v19, %v3547_v61  ;;  %v963_v49 = vmul.f32 %v2797_v2, %v3548_v13 }
 0x274   : > { %v889_v27 = vadd.f32 %v2872_v5, %v888_v22  ;;  %v986_v10 = vadd.f32 %v985_v59, %v923_v35  ;;  %v1003_v48 = vadd.f32 %v1002_v41, %v939_v28  ;;  %v941_v56 = vmul.f32 %v2880_v1, %v3544_v45  ;;  %v3546_v59 = vld [vmem:[#allocation60_spill] sm:$0xff]  ;;  %v3552_v28 = vld [vmem:[#allocation74_spill] sm:$0xff] }
 0x275   : > { %v962_v22 = vmul.f32 %v2788_v46, %v3545_v57  ;;  %v1027_v58 = vadd.f32 %v1026_v42, %v961_v52  ;;  %v951_v36 = vmul.f32 %v2829_v43, %v3546_v59  ;;  %v965_v29 = vmul.f32 %v2815_v26, %v3552_v28  ;;  %v3557_v52 = vld [vmem:[#allocation65_spill] sm:$0xff]  ;;  %v3559_v11 = vld [vmem:[#allocation66_spill] sm:$0xff]  ;;  %v3561_v57 = vld [vmem:[#allocation67_spill] sm:$0xff] }
 0x276   : > { %v890_v34 = vadd.f32 %v2880_v1, %v889_v27  ;;  %v987_v16 = vadd.f32 %v986_v10, %v924_v50  ;;  %v1004_v21 = vadd.f32 %v1003_v48, %v940_v18  ;;  %v952_v27 = vmul.f32 %v2836_v7, %v3549_v9  ;;  %v3550_v50 = vld [vmem:[#allocation73_spill] sm:$0xff]  ;;  %v3553_v18 = vld [vmem:[#allocation63_spill] sm:$0xff]  ;;  %v3560_v45 = vld [vmem:[#allocation78_spill] sm:$0xff] }
 0x277   : > { %v1028_v30 = vadd.f32 %v1027_v58, %v962_v22  ;;  %v1016_v46 = vadd.f32 %v1015_v37, %v951_v36  ;;  %v964_v10 = vmul.f32 %v2806_v23, %v3550_v50  ;;  %v954_v41 = vmul.f32 %v2854_v60, %v3553_v18  ;;  %v3562_v58 = vld [vmem:[#allocation79_spill] sm:$0xff]  ;;  %v3563_v37 = vld [vmem:[#allocation80_spill] sm:$0xff] }
 0x278   : > { %v891_v53 = vadd.f32 %v2891_v19, %v890_v34  ;;  %v988_v54 = vadd.f32 %v987_v16, %v925_v0  ;;  %v1005_v12 = vadd.f32 %v1004_v21, %v941_v56  ;;  %v953_v0 = vmul.f32 %v2847_v4, %v3551_v17  ;;  %v3554_v16 = vld [vmem:[#allocation75_spill] sm:$0xff] }
 0x279   : > { %v1029_v63 = vadd.f32 %v1028_v30, %v963_v49  ;;  %v1017_v14 = vadd.f32 %v1016_v46, %v952_v27  ;;  %v966_v31 = vmul.f32 %v2822_v33, %v3554_v16  ;;  %v955_v23 = vmul.f32 %v2863_v44, %v3555_v25  ;;  %v875_v46 = vld [vmem:[#allocation3] sm:$0x1] }
 0x27a   : > { %892 = vadd.xlane.f32.xlu0 %v891_v53  ;;  %v989_v35 = vadd.f32 %v988_v54, %v926_v8  ;;  %v1006_v38 = vadd.f32 %v1005_v12, %v942_v24  ;;  %v3556_v8 = vld [vmem:[#allocation76_spill] sm:$0xff]  ;;  %v956_v26 = vmul.f32 %v2872_v5, %v3557_v52  ;;  %v3558_v53 = vld [vmem:[#allocation77_spill] sm:$0xff]  ;;  %v957_v33 = vmul.f32 %v2880_v1, %v3559_v11  ;;  %v900_v28 = vld [vmem:[#allocation4 + $0x18] sm:$0xff] }
 0x27b   : > { %v1030_v2 = vadd.f32 %v1029_v63, %v964_v10  ;;  %v1018_v34 = vadd.f32 %v1017_v14, %v953_v0  ;;  %v967_v48 = vmul.f32 %v2829_v43, %v3556_v8  ;;  %v968_v54 = vmul.f32 %v2836_v7, %v3558_v53  ;;  %v3564_v24 = vld [vmem:[#allocation81_spill] sm:$0xff]  ;;  %v1076_v11 = vld [vmem:[%s3283_s3 + $0x18] sm:$0xff] (!%p1528_p8) }
 0x27c   : > { %990 = vadd.xlane.f32.xlu1 %v989_v35  ;;  %v969_v56 = vmul.f32 %v2847_v4, %v3560_v45  ;;  %v958_v43 = vmul.f32 %v2891_v19, %v3561_v57  ;;  %v970_v35 = vmul.f32 %v2854_v60, %v3562_v58  ;;  %v971_v7 = vmul.f32 %v2863_v44, %v3563_v37  ;;  %v898_v63 = vld [vmem:[#allocation4 + $0x8] sm:$0xff] }
 0x27d   : > { %v1031_v3 = vadd.f32 %v1030_v2, %v965_v29  ;;  %v1019_v47 = vadd.f32 %v1018_v34, %v954_v41  ;;  %v972_v12 = vmul.f32 %v2872_v5, %v3564_v24  ;;  %v973_v4 = vmul.f32 %v2880_v1, %v3487_v62  ;;  %v1075_v53 = vld [vmem:[%s3283_s3 + $0x10] sm:$0xff] (!%p1528_p8) }
 0x27e   : > { %1007 = vadd.xlane.f32.xlu0 %v1006_v38  ;;  %v974_v30 = vmul.f32 %v2891_v19, %v3488_v20  ;;  %v816_v44 = vmul.f32 1.442695, %v815_v39  ;;  %v897_v38 = vld [vmem:[#allocation4] sm:$0xff]  ;;  %v899_v39 = vld [vmem:[#allocation4 + $0x10] sm:$0xff]  ;;  %v1891_v34 = vmov (!%p1528_p8), 0  }
 0x27f   : > { %v1032_v40 = vadd.f32 %v1031_v3, %v966_v31  ;;  %v1020_v42 = vadd.f32 %v1019_v47, %v955_v23  ;;  %1707 = vset.pattern.permute.xlu1 (!%p1528_p8), %v1891_v34  ;;  %1706 = vset.pattern.permute.xlu0 (!%p1528_p8), %v1891_v34 }
 0x280   : > { %1704 = vpow2.f32 %v816_v44 }
 0x281   : > { %v1033_v15 = vadd.f32 %v1032_v40, %v967_v48  ;;  %v1021_v55 = vadd.f32 %v1020_v42, %v956_v26  ;;  %v1073_v26 = vld [vmem:[%s3283_s3] sm:$0xff] (!%p1528_p8) }
 0x283   : > { %v1034_v21 = vadd.f32 %v1033_v15, %v968_v54  ;;  %v1022_v22 = vadd.f32 %v1021_v55, %v957_v33  ;;  %v1074_v54 = vld [vmem:[%s3283_s3 + $0x8] sm:$0xff] (!%p1528_p8) }
 0x285   : > { %v1035_v59 = vadd.f32 %v1034_v21, %v969_v56  ;;  %v1023_v36 = vadd.f32 %v1022_v22, %v958_v43 }
 0x287   : > { %v1036_v61 = vadd.f32 %v1035_v59, %v970_v35  ;;  %1024 = vadd.xlane.f32.xlu1 %v1023_v36 }
 0x289   : > { %v1037_v13 = vadd.f32 %v1036_v61, %v971_v7 }
 0x28a   : > { %v1705_v27 = vpop.eup %1704 }
 0x28b   : > { %v1038_v49 = vadd.f32 %v1037_v13, %v972_v12  ;;  %v905_v5 = vrot.slane %v1705_v27, %v3502_v51  ;;  %v876_v50 = vmul.f32 %v1705_v27, %v875_v46  ;;  %v1115_v13 = vld [vmem:[%s3565_s27] sm:$0x1] (!%p1528_p8) }
 0x28d   : > { %v1039_v9 = vadd.f32 %v1038_v49, %v973_v4  ;;  %v907_v1 = vmul.f32 %v905_v5, %v897_v38  ;;  %v908_v17 = vmul.f32 %v905_v5, %v898_v63  ;;  %v909_v51 = vmul.f32 %v905_v5, %v899_v39  ;;  %v1134_v63 = vld [vmem:[%s3567_s14] sm:$0x1] (!%p1528_p8)  ;;  %v3570_v39 = vld [vmem:[#allocation84_spill] sm:$0xff] (!%p1528_p8)  ;;  %s3571_s14 = sld [smem:[#allocation104_spill]] (!%p1528_p8) }
 0x28e   : > { %v910_v29 = vmul.f32 %v905_v5, %v900_v28 }
 0x28f   : > { %v1040_v60 = vadd.f32 %v1039_v9, %v974_v30 }
 0x291   : > { %1041 = vadd.xlane.f32.xlu0 %v1040_v60 }
 0x293   : > { %s3572_s30 = smov (!%p1528_p8), %s3571_s14 }
 0x307   : > { %v893_v10 = vpop.xlane.xlu0 %892 }
 0x308   : > { %v894_v62 = vadd.f32 %v893_v10, %v876_v50 }
 0x309   : > { %v991_v20 = vpop.xlane.xlu1 %990 }
 0x30a   : > { %896 = vst.msk [vmem:[#allocation3] sm:$0x1] %vm895_vm2, %v894_v62  ;;  %v1043_v19 = vadd.f32 %v991_v20, %v907_v1  ;;  %v1132_v62 = vld [vmem:[%s3566_s18] sm:$0x1] (!%p1528_p8) }
 0x30b   : > { %v1008_v32 = vpop.xlane.xlu0 %1007 }
 0x30c   : > { %1048 = vst.msk [vmem:[#allocation4] sm:$0xff] %vm1047_vm3, %v1043_v19  ;;  %v1044_v6 = vadd.f32 %v1008_v32, %v908_v17  ;;  %v1139_v32 = vld [vmem:[%s3568_s19 + $0x10] sm:$0xff] (!%p1528_p8) }
 0x30e   : > { %1049 = vst.msk [vmem:[#allocation4 + $0x8] sm:$0xff] %vm1047_vm3, %v1044_v6  ;;  %v1137_v6 = vld [vmem:[%s3569_s10] sm:$0xff] (!%p1528_p8) }
 0x311   : > { %v1529_v41 = vld [vmem:[#allocation3] ss:$0 sm:$0xff] (!%p1528_p8) }
 0x312   : > { %1708 = vrcp.f32 (!%p1528_p8), %v1529_v41  ;;  %v1140_v41 = vld [vmem:[%s3569_s10 + $0x18] sm:$0xff] (!%p1528_p8) }
 0x313   : > { %v1057_v31 = vld [vmem:[#allocation4] sm:$0xff] (!%p1528_p8) }
 0x314   : > { %v1025_v0 = vpop.xlane.xlu1 %1024 }
 0x315   : > { %v1045_v14 = vadd.f32 %v1025_v0, %v909_v51  ;;  %v1058_v23 = vld [vmem:[#allocation4 + $0x8] sm:$0xff] (!%p1528_p8) }
 0x316   : > { %v1138_v0 = vld [vmem:[%s3569_s10 + $0x8] sm:$0xff] (!%p1528_p8) }
 0x317   : > { %1050 = vst.msk [vmem:[#allocation4 + $0x10] sm:$0xff] %vm1047_vm3, %v1045_v14 }
 0x31b   : > { %1056 = sbr.rel (%p1528_p8) target bundleno = 1431 (0x597), region = 72 }
 0x31c   : > { %v1709_v3 = vpop.eup (!%p1528_p8), %1708 }
 0x31d   : > { %v1069_v8 = vmul.f32 (!%p1528_p8), %v1709_v3, %v1057_v31  ;;  %v1070_v40 = vmul.f32 (!%p1528_p8), %v1709_v3, %v1058_v23 }
 0x31e   : > { %v1042_v2 = vpop.xlane.xlu0 %1041  ;;  %v1059_v16 = vld [vmem:[#allocation4 + $0x10] sm:$0xff] (!%p1528_p8) }
 0x31f   : > { %v1046_v18 = vadd.f32 %v1042_v2, %v910_v29  ;;  %v1071_v47 = vmul.f32 (!%p1528_p8), %v1709_v3, %v1059_v16  ;;  %1079 = vperm.xlu0 (!%p1528_p8), %1706, %v1069_v8  }
 0x321   : > { %1051 = vst.msk [vmem:[#allocation4 + $0x18] sm:$0xff] %vm1047_vm3, %v1046_v18  ;;  %1089 = vperm.xlu1 (!%p1528_p8), %1707, %v1071_v47  }
 0x323   : > { %1084 = vperm.xlu0 %1706, %v1070_v40   ;;  %v1162_v40 = vld [vmem:[%s3572_s30 + $0x8] sm:$0xff] }
 0x328   : > { %v1060_v25 = vld [vmem:[#allocation4 + $0x18] sm:$0xff] }
 0x329   : > { %v1072_v48 = vmul.f32 %v1709_v3, %v1060_v25  ;;  %v1163_v3 = vld [vmem:[%s3571_s14 + $0x10] sm:$0xff]  ;;  %v1161_v25 = vld [vmem:[%s3572_s30] sm:$0xff] }
 0x32b   : > { %1094 = vperm.xlu1 %1707, %v1072_v48  }
 0x39e   : > { %v1080_v42 = vpop.permute.xlu0 %1079 }
 0x39f   : > { %v1097_v15 = vmul.f32 %v1080_v42, %v1073_v26  ;;  %v1164_v42 = vld [vmem:[%s3572_s30 + $0x18] sm:$0xff] }
 0x3a0   : > { %v1090_v52 = vpop.permute.xlu1 %1089 }
 0x3a1   : > { %v1099_v45 = vmul.f32 %v1090_v52, %v1075_v53  ;;  %v1102_v21 = vsel %vm1101_vm4, %v1097_v15, 0.0 }
 0x3a2   : > { %v1085_v55 = vpop.permute.xlu0 %1084 }
 0x3a3   : > { %v1098_v56 = vmul.f32 %v1085_v55, %v1074_v54  ;;  %v1105_v58 = vsel %vm1101_vm4, %v1099_v45, 0.0 }
 0x3a5   : > { %v1103_v43 = vsel %vm1101_vm4, %v1098_v56, 0.0 }
 0x3a6   : > { %v1104_v22 = vadd.f32 %v1103_v43, %v1102_v21 }
 0x3a8   : > { %v1106_v35 = vadd.f32 %v1105_v58, %v1104_v22 }
 0x3aa   : > { %v1095_v33 = vpop.permute.xlu1 %1094 }
 0x3ab   : > { %v1100_v57 = vmul.f32 %v1095_v33, %v1076_v11 }
 0x3ad   : > { %v1107_v59 = vsel %vm1101_vm4, %v1100_v57, 0.0 }
 0x3ae   : > { %v1108_v36 = vadd.f32 %v1107_v59, %v1106_v35 }
 0x3b0   : > { %v1109_v37 = vrot.slane %v1108_v36, 4 }
 0x3b2   : > { %v1110_v7 = vadd.f32 %v1109_v37, %v1108_v36 }
 0x3b4   : > { %v1111_v61 = vrot.slane %v1110_v7, 2 }
 0x3b6   : > { %v1112_v24 = vadd.f32 %v1111_v61, %v1110_v7 }
 0x3b8   : > { %v1113_v12 = vrot.slane %v1112_v24, 1 }
 0x3ba   : > { %v1114_v4 = vadd.f32 %v1113_v12, %v1112_v24 }
 0x3bc   : > { %v1116_v49 = vadd.f32 %v1115_v13, %v1114_v4 }
 0x3be   : > { %v1118_v30 = vsel %vm1117_vm5, %v1116_v49, 0.0 }
 0x3bf   : > { %1119 = vadd.xlane.f32.xlu0 %v1118_v30 }
 0x44c   : > { %v1120_v9 = vpop.xlane.xlu0 %1119 }
 0x44d   : > { %v1122_v60 = vmul.f32 0.125, %v1120_v9 }
 0x44f   : > { %v1123_v44 = vsub.f32 %v1116_v49, %v1122_v60 }
 0x451   : > { %v1124_v27 = vmul.f32 %v1123_v44, %v1123_v44 }
 0x453   : > { %v1125_v46 = vsel %vm1117_vm5, %v1124_v27, 0.0 }
 0x454   : > { %1126 = vadd.xlane.f32.xlu1 %v1125_v46 }
 0x4e1   : > { %v1127_v5 = vpop.xlane.xlu1 %1126 }
 0x4e2   : > { %v1128_v38 = vmul.f32 0.125, %v1127_v5 }
 0x4e4   : > { %v1129_v50 = vadd.f32 1e-05, %v1128_v38 }
 0x4e6   : > { %1710 = vrsqrt.f32 %v1129_v50 }
 0x4f0   : > { %v1711_v10 = vpop.eup %1710 }
 0x4f1   : > { %v1131_v1 = vmul.f32 %v1711_v10, %v1123_v44 }
 0x4f3   : > { %v1133_v20 = vmul.f32 %v1132_v62, %v1131_v1 }
 0x4f5   : > { %v1135_v19 = vadd.f32 %v1134_v63, %v1133_v20 }
 0x4f7   : > { %v1136_v17 = vmax.f32 %v1135_v19, 0.0 }
 0x4f9   : > { %v1144_v51 = vrot.slane %v1136_v17, %v3570_v39 }
 0x4fb   : > { %v1147_v14 = vmul.f32 %v1144_v51, %v1139_v32  ;;  %v1145_v28 = vmul.f32 %v1144_v51, %v1137_v6  ;;  %v1146_v18 = vmul.f32 %v1144_v51, %v1138_v0  ;;  %v1148_v16 = vmul.f32 %v1144_v51, %v1140_v41 }
 0x4fd   : > { %v1155_v29 = vsel %vm1101_vm4, %v1147_v14, 0.0  ;;  %v1149_v2 = vsel %vm1101_vm4, %v1145_v28, 0.0  ;;  %v1152_v34 = vsel %vm1101_vm4, %v1146_v18, 0.0  ;;  %v1158_v31 = vsel %vm1101_vm4, %v1148_v16, 0.0 }
 0x4fe   : > { %1156 = vadd.xlane.f32.xlu1 %v1155_v29  ;;  %1150 = vadd.xlane.f32.xlu0 %v1149_v2 }
 0x502   : > { %1153 = vadd.xlane.f32.xlu0 %v1152_v34 }
 0x506   : > { %1159 = vadd.xlane.f32.xlu0 %v1158_v31 }
 0x58b   : > { %v1157_v23 = vpop.xlane.xlu1 %1156  ;;  %v1151_v47 = vpop.xlane.xlu0 %1150 }
 0x58c   : > { %v1167_v8 = vadd.f32 %v1163_v3, %v1157_v23  ;;  %v1165_v48 = vadd.f32 %v1161_v25, %v1151_v47 }
 0x58e   : > { %1171 = vst.msk [vmem:[#allocation5 + $0x10] sm:$0xff] %vm1047_vm3, %v1167_v8  ;;  %1169 = vst.msk [vmem:[#allocation5] sm:$0xff] %vm1047_vm3, %v1165_v48 }
 0x58f   : > { %v1154_v52 = vpop.xlane.xlu0 %1153 }
 0x590   : > { %v1166_v26 = vadd.f32 %v1162_v40, %v1154_v52 }
 0x592   : > { %1170 = vst.msk [vmem:[#allocation5 + $0x8] sm:$0xff] %vm1047_vm3, %v1166_v26 }
 0x593   : > { %v1160_v53 = vpop.xlane.xlu0 %1159 }
 0x594   : > { %v1168_v54 = vadd.f32 %v1164_v42, %v1160_v53 }
 0x596   : > { %1172 = vst.msk [vmem:[#allocation5 + $0x18] sm:$0xff] %vm1047_vm3, %v1168_v54 }
 0x597 PF: > { %p1530_p4 = scmp.ne.s32.totalorder %s1862_s2, 1 }
 0x598   : > { %v1246_v15 = vld [vmem:[#allocation5 + $0x10] sm:$0xff] (!%p1530_p4)  ;;  %v1244_v11 = vld [vmem:[#allocation5] sm:$0xff] (!%p1530_p4)  ;;  %v1892_v33 = vmov (!%p1530_p4), 0   ;;  %s1540_s7 = sshll.u32 (!%p1530_p4), %s1858_s17, 9 }
 0x599   : > { %1176 = sbr.rel (%p1530_p4) target bundleno = 1597 (0x63d), region = 76  ;;  %1713 = vset.pattern.permute.xlu1 (!%p1530_p4), %v1892_v33  ;;  %1712 = vset.pattern.permute.xlu0 (!%p1530_p4), %v1892_v33  ;;  %v1245_v45 = vld [vmem:[#allocation5 + $0x8] sm:$0xff] (!%p1530_p4)  ;;  %s3028_s18 = scalar_lea.vmem (!%p1530_p4), [#allocation6], %s1540_s7 }
 0x59a   : > { %1260 = vperm.xlu1 (!%p1530_p4), %1713, %v1246_v15   ;;  %1250 = vperm.xlu0 (!%p1530_p4), %1712, %v1244_v11   ;;  %v1212_v56 = vld [vmem:[%s3028_s18 + $0x100] sm:$0xff] (!%p1530_p4)  ;;  %v1213_v21 = vld [vmem:[%s3028_s18 + $0x108] sm:$0xff] (!%p1530_p4)  ;;  %v1214_v57 = vld [vmem:[%s3028_s18 + $0x110] sm:$0xff] (!%p1530_p4) }
 0x59b   : > { %v1215_v43 = vld [vmem:[%s3028_s18 + $0x118] sm:$0xff] (!%p1530_p4)  ;;  %v1216_v22 = vld [vmem:[%s3028_s18 + $0x120] sm:$0xff] (!%p1530_p4)  ;;  %v1217_v58 = vld [vmem:[%s3028_s18 + $0x128] sm:$0xff] (!%p1530_p4) }
 0x59c   : > { %v1218_v35 = vld [vmem:[%s3028_s18 + $0x130] sm:$0xff] (!%p1530_p4)  ;;  %v1219_v59 = vld [vmem:[%s3028_s18 + $0x138] sm:$0xff] (!%p1530_p4)  ;;  %v1220_v36 = vld [vmem:[%s3028_s18 + $0x140] sm:$0xff] (!%p1530_p4) }
 0x59d   : > { %v1247_v55 = vld [vmem:[#allocation5 + $0x18] sm:$0xff] (!%p1530_p4)  ;;  %v1221_v37 = vld [vmem:[%s3028_s18 + $0x148] sm:$0xff] (!%p1530_p4)  ;;  %v1222_v7 = vld [vmem:[%s3028_s18 + $0x150] sm:$0xff] (!%p1530_p4) }
 0x59e   : > { %1265 = vperm.xlu1 (!%p1530_p4), %1713, %v1247_v55   ;;  %1255 = vperm.xlu0 (!%p1530_p4), %1712, %v1245_v45   ;;  %v1223_v61 = vld [vmem:[%s3028_s18 + $0x158] sm:$0xff] (!%p1530_p4)  ;;  %v1224_v24 = vld [vmem:[%s3028_s18 + $0x160] sm:$0xff] (!%p1530_p4)  ;;  %v1225_v12 = vld [vmem:[%s3028_s18 + $0x168] sm:$0xff] (!%p1530_p4) }
 0x59f   : > { %v1226_v13 = vld [vmem:[%s3028_s18 + $0x170] sm:$0xff] (!%p1530_p4)  ;;  %v1227_v4 = vld [vmem:[%s3028_s18 + $0x178] sm:$0xff] (!%p1530_p4)  ;;  %v1180_v30 = vld [vmem:[%s3028_s18] sm:$0xff] (!%p1530_p4) }
 0x5a0   : > { %v1181_v9 = vld [vmem:[%s3028_s18 + $0x8] sm:$0xff]  ;;  %v1182_v60 = vld [vmem:[%s3028_s18 + $0x10] sm:$0xff]  ;;  %v1183_v44 = vld [vmem:[%s3028_s18 + $0x18] sm:$0xff] }
 0x5a1   : > { %v1184_v50 = vld [vmem:[%s3028_s18 + $0x20] sm:$0xff]  ;;  %v1185_v10 = vld [vmem:[%s3028_s18 + $0x28] sm:$0xff]  ;;  %v1186_v62 = vld [vmem:[%s3028_s18 + $0x30] sm:$0xff] }
 0x5a2   : > { %v1187_v1 = vld [vmem:[%s3028_s18 + $0x38] sm:$0xff]  ;;  %v1188_v6 = vld [vmem:[%s3028_s18 + $0x40] sm:$0xff]  ;;  %v1189_v39 = vld [vmem:[%s3028_s18 + $0x48] sm:$0xff] }
 0x5a3   : > { %v1190_v51 = vld [vmem:[%s3028_s18 + $0x50] sm:$0xff]  ;;  %v1191_v0 = vld [vmem:[%s3028_s18 + $0x58] sm:$0xff]  ;;  %v1192_v18 = vld [vmem:[%s3028_s18 + $0x60] sm:$0xff] }
 0x5a4   : > { %v1193_v41 = vld [vmem:[%s3028_s18 + $0x68] sm:$0xff]  ;;  %v1194_v34 = vld [vmem:[%s3028_s18 + $0x70] sm:$0xff]  ;;  %v1195_v16 = vld [vmem:[%s3028_s18 + $0x78] sm:$0xff] }
 0x5a5   : > { %v1228_v47 = vld [vmem:[%s3028_s18 + $0x180] sm:$0xff]  ;;  %v1229_v8 = vld [vmem:[%s3028_s18 + $0x188] sm:$0xff]  ;;  %v1230_v48 = vld [vmem:[%s3028_s18 + $0x190] sm:$0xff] }
 0x5a6   : > { %v1231_v40 = vld [vmem:[%s3028_s18 + $0x198] sm:$0xff]  ;;  %v1232_v54 = vld [vmem:[%s3028_s18 + $0x1a0] sm:$0xff]  ;;  %v1233_v15 = vld [vmem:[%s3028_s18 + $0x1a8] sm:$0xff] }
 0x5a7   : > { %v1234_v11 = vld [vmem:[%s3028_s18 + $0x1b0] sm:$0xff]  ;;  %v1235_v33 = vld [vmem:[%s3028_s18 + $0x1b8] sm:$0xff] }
 0x619   : > { %v1261_v49 = vpop.permute.xlu1 %1260  ;;  %v3054_v32 = vpop.permute.xlu0 %1250 }
 0x61a   : > { %v1300_v27 = vadd.f32 %v1261_v49, %v1212_v56  ;;  %v1301_v46 = vadd.f32 %v1261_v49, %v1213_v21  ;;  %v1302_v5 = vadd.f32 %v1261_v49, %v1214_v57  ;;  %v1303_v38 = vadd.f32 %v1261_v49, %v1215_v43  ;;  %v1236_v43 = vld [vmem:[%s3028_s18 + $0x1c0] sm:$0xff] }
 0x61b   : > { %v1304_v63 = vadd.f32 %v1261_v49, %v1216_v22  ;;  %v1305_v20 = vadd.f32 %v1261_v49, %v1217_v58  ;;  %v1306_v19 = vadd.f32 %v1261_v49, %v1218_v35  ;;  %v1307_v17 = vadd.f32 %v1261_v49, %v1219_v59  ;;  %v1237_v22 = vld [vmem:[%s3028_s18 + $0x1c8] sm:$0xff]  ;;  %v1238_v58 = vld [vmem:[%s3028_s18 + $0x1d0] sm:$0xff] }
 0x61c   : > { %v1308_v14 = vadd.f32 %v1261_v49, %v1220_v36  ;;  %v1309_v28 = vadd.f32 %v1261_v49, %v1221_v37  ;;  %v1310_v29 = vadd.f32 %v1261_v49, %v1222_v7  ;;  %v1311_v2 = vadd.f32 %v1261_v49, %v1223_v61  ;;  %1364 = vst [vmem:[%s2139_s29 + $0x100] sm:$0xff] %v1300_v27  ;;  %v1239_v7 = vld [vmem:[%s3028_s18 + $0x1d8] sm:$0xff]  ;;  %v1240_v61 = vld [vmem:[%s3028_s18 + $0x1e0] sm:$0xff] }
 0x61d   : > { %1365 = vst [vmem:[%s2139_s29 + $0x108] sm:$0xff] %v1301_v46  ;;  %1366 = vst [vmem:[%s2139_s29 + $0x110] sm:$0xff] %v1302_v5  ;;  %v1312_v31 = vadd.f32 %v1261_v49, %v1224_v24  ;;  %v1313_v3 = vadd.f32 %v1261_v49, %v1225_v12  ;;  %v1314_v25 = vadd.f32 %v1261_v49, %v1226_v13  ;;  %v3096_v57 = vpop.permute.xlu1 %1265  ;;  %v1241_v24 = vld [vmem:[%s3028_s18 + $0x1e8] sm:$0xff] }
 0x61e   : > { %1367 = vst [vmem:[%s2139_s29 + $0x118] sm:$0xff] %v1303_v38  ;;  %v1315_v23 = vadd.f32 %v1261_v49, %v1227_v4  ;;  %1368 = vst [vmem:[%s2139_s29 + $0x120] sm:$0xff] %v1304_v63  ;;  %v1268_v52 = vadd.f32 %v3054_v32, %v1180_v30  ;;  %v1269_v26 = vadd.f32 %v3054_v32, %v1181_v9  ;;  %v1242_v30 = vld [vmem:[%s3028_s18 + $0x1f0] sm:$0xff]  ;;  %v1243_v9 = vld [vmem:[%s3028_s18 + $0x1f8] sm:$0xff] }
 0x61f   : > { %1369 = vst [vmem:[%s2139_s29 + $0x128] sm:$0xff] %v1305_v20  ;;  %1370 = vst [vmem:[%s2139_s29 + $0x130] sm:$0xff] %v1306_v19  ;;  %v1270_v42 = vadd.f32 %v3054_v32, %v1182_v60  ;;  %v1271_v53 = vadd.f32 %v3054_v32, %v1183_v44  ;;  %v1272_v55 = vadd.f32 %v3054_v32, %v1184_v50  ;;  %v1196_v60 = vld [vmem:[%s3028_s18 + $0x80] sm:$0xff]  ;;  %v1197_v38 = vld [vmem:[%s3028_s18 + $0x88] sm:$0xff]  ;;  %v1256_v19 = vpop.permute.xlu0 %1255 }
 0x620   : > { %1371 = vst [vmem:[%s2139_s29 + $0x138] sm:$0xff] %v1307_v17  ;;  %1372 = vst [vmem:[%s2139_s29 + $0x140] sm:$0xff] %v1308_v14  ;;  %v1273_v45 = vadd.f32 %v3054_v32, %v1185_v10  ;;  %v1274_v56 = vadd.f32 %v3054_v32, %v1186_v62  ;;  %v1275_v21 = vadd.f32 %v3054_v32, %v1187_v1  ;;  %v1198_v50 = vld [vmem:[%s3028_s18 + $0x90] sm:$0xff]  ;;  %v1199_v10 = vld [vmem:[%s3028_s18 + $0x98] sm:$0xff] }
 0x621   : > { %1373 = vst [vmem:[%s2139_s29 + $0x148] sm:$0xff] %v1309_v28  ;;  %1374 = vst [vmem:[%s2139_s29 + $0x150] sm:$0xff] %v1310_v29  ;;  %v1276_v35 = vadd.f32 %v3054_v32, %v1188_v6  ;;  %v1277_v59 = vadd.f32 %v3054_v32, %v1189_v39  ;;  %v1278_v36 = vadd.f32 %v3054_v32, %v1190_v51  ;;  %v1200_v17 = vld [vmem:[%s3028_s18 + $0xa0] sm:$0xff]  ;;  %v1202_v6 = vld [vmem:[%s3028_s18 + $0xb0] sm:$0xff] }
 0x622   : > { %1375 = vst [vmem:[%s2139_s29 + $0x158] sm:$0xff] %v1311_v2  ;;  %1376 = vst [vmem:[%s2139_s29 + $0x160] sm:$0xff] %v1312_v31  ;;  %v1279_v37 = vadd.f32 %v3054_v32, %v1191_v0  ;;  %v1280_v12 = vadd.f32 %v3054_v32, %v1192_v18  ;;  %v1281_v13 = vadd.f32 %v3054_v32, %v1193_v41  ;;  %v1203_v28 = vld [vmem:[%s3028_s18 + $0xb8] sm:$0xff]  ;;  %v1204_v29 = vld [vmem:[%s3028_s18 + $0xc0] sm:$0xff] }
 0x623   : > { %1377 = vst [vmem:[%s2139_s29 + $0x168] sm:$0xff] %v1313_v3  ;;  %1378 = vst [vmem:[%s2139_s29 + $0x170] sm:$0xff] %v1314_v25  ;;  %v1282_v4 = vadd.f32 %v3054_v32, %v1194_v34  ;;  %v1283_v49 = vadd.f32 %v3054_v32, %v1195_v16  ;;  %v1316_v44 = vadd.f32 %v3096_v57, %v1228_v47  ;;  %v1201_v32 = vld [vmem:[%s3028_s18 + $0xa8] sm:$0xff]  ;;  %v1206_v31 = vld [vmem:[%s3028_s18 + $0xd0] sm:$0xff] }
 0x624   : > { %1379 = vst [vmem:[%s2139_s29 + $0x178] sm:$0xff] %v1315_v23  ;;  %1332 = vst [vmem:[%s2139_s29] sm:$0xff] %v1268_v52  ;;  %v1317_v27 = vadd.f32 %v3096_v57, %v1229_v8  ;;  %v1318_v46 = vadd.f32 %v3096_v57, %v1230_v48  ;;  %v1319_v5 = vadd.f32 %v3096_v57, %v1231_v40  ;;  %v1205_v2 = vld [vmem:[%s3028_s18 + $0xc8] sm:$0xff]  ;;  %v1207_v3 = vld [vmem:[%s3028_s18 + $0xd8] sm:$0xff] }
 0x625   : > { %1333 = vst [vmem:[%s2139_s29 + $0x8] sm:$0xff] %v1269_v26  ;;  %1334 = vst [vmem:[%s2139_s29 + $0x10] sm:$0xff] %v1270_v42  ;;  %v1320_v62 = vadd.f32 %v3096_v57, %v1232_v54  ;;  %v1321_v1 = vadd.f32 %v3096_v57, %v1233_v15  ;;  %v1322_v63 = vadd.f32 %v3096_v57, %v1234_v11  ;;  %v1208_v25 = vld [vmem:[%s3028_s18 + $0xe0] sm:$0xff]  ;;  %v1209_v23 = vld [vmem:[%s3028_s18 + $0xe8] sm:$0xff] }
 0x626   : > { %1335 = vst [vmem:[%s2139_s29 + $0x18] sm:$0xff] %v1271_v53  ;;  %1336 = vst [vmem:[%s2139_s29 + $0x20] sm:$0xff] %v1272_v55  ;;  %v1323_v20 = vadd.f32 %v3096_v57, %v1235_v33  ;;  %v1324_v39 = vadd.f32 %v3096_v57, %v1236_v43  ;;  %v1325_v51 = vadd.f32 %v3096_v57, %v1237_v22  ;;  %v1210_v47 = vld [vmem:[%s3028_s18 + $0xf0] sm:$0xff]  ;;  %v1211_v8 = vld [vmem:[%s3028_s18 + $0xf8] sm:$0xff] }
 0x627   : > { %1337 = vst [vmem:[%s2139_s29 + $0x28] sm:$0xff] %v1273_v45  ;;  %1338 = vst [vmem:[%s2139_s29 + $0x30] sm:$0xff] %v1274_v56  ;;  %v1326_v0 = vadd.f32 %v3096_v57, %v1238_v58  ;;  %v1327_v14 = vadd.f32 %v3096_v57, %v1239_v7  ;;  %v1328_v18 = vadd.f32 %v3096_v57, %v1240_v61 }
 0x628   : > { %1339 = vst [vmem:[%s2139_s29 + $0x38] sm:$0xff] %v1275_v21  ;;  %1340 = vst [vmem:[%s2139_s29 + $0x40] sm:$0xff] %v1276_v35  ;;  %v1329_v41 = vadd.f32 %v3096_v57, %v1241_v24  ;;  %v1330_v34 = vadd.f32 %v3096_v57, %v1242_v30  ;;  %v1331_v16 = vadd.f32 %v3096_v57, %v1243_v9 }
 0x629   : > { %1341 = vst [vmem:[%s2139_s29 + $0x48] sm:$0xff] %v1277_v59  ;;  %1342 = vst [vmem:[%s2139_s29 + $0x50] sm:$0xff] %v1278_v36  ;;  %v1284_v48 = vadd.f32 %v1256_v19, %v1196_v60  ;;  %v1285_v40 = vadd.f32 %v1256_v19, %v1197_v38  ;;  %v1286_v52 = vadd.f32 %v1256_v19, %v1198_v50 }
 0x62a   : > { %1343 = vst [vmem:[%s2139_s29 + $0x58] sm:$0xff] %v1279_v37  ;;  %1344 = vst [vmem:[%s2139_s29 + $0x60] sm:$0xff] %v1280_v12  ;;  %v1287_v26 = vadd.f32 %v1256_v19, %v1199_v10  ;;  %v1288_v42 = vadd.f32 %v1256_v19, %v1200_v17  ;;  %v1289_v53 = vadd.f32 %v1256_v19, %v1201_v32 }
 0x62b   : > { %1345 = vst [vmem:[%s2139_s29 + $0x68] sm:$0xff] %v1281_v13  ;;  %1346 = vst [vmem:[%s2139_s29 + $0x70] sm:$0xff] %v1282_v4  ;;  %v1290_v54 = vadd.f32 %v1256_v19, %v1202_v6  ;;  %v1291_v15 = vadd.f32 %v1256_v19, %v1203_v28  ;;  %v1292_v11 = vadd.f32 %v1256_v19, %v1204_v29 }
 0x62c   : > { %1347 = vst [vmem:[%s2139_s29 + $0x78] sm:$0xff] %v1283_v49  ;;  %1380 = vst [vmem:[%s2139_s29 + $0x180] sm:$0xff] %v1316_v44  ;;  %v1293_v33 = vadd.f32 %v1256_v19, %v1205_v2  ;;  %v1294_v55 = vadd.f32 %v1256_v19, %v1206_v31  ;;  %v1295_v45 = vadd.f32 %v1256_v19, %v1207_v3 }
 0x62d   : > { %1381 = vst [vmem:[%s2139_s29 + $0x188] sm:$0xff] %v1317_v27  ;;  %1382 = vst [vmem:[%s2139_s29 + $0x190] sm:$0xff] %v1318_v46  ;;  %v1296_v56 = vadd.f32 %v1256_v19, %v1208_v25  ;;  %v1297_v21 = vadd.f32 %v1256_v19, %v1209_v23  ;;  %v1298_v57 = vadd.f32 %v1256_v19, %v1210_v47 }
 0x62e   : > { %1383 = vst [vmem:[%s2139_s29 + $0x198] sm:$0xff] %v1319_v5  ;;  %1384 = vst [vmem:[%s2139_s29 + $0x1a0] sm:$0xff] %v1320_v62  ;;  %v1299_v43 = vadd.f32 %v1256_v19, %v1211_v8 }
 0x62f   : > { %1385 = vst [vmem:[%s2139_s29 + $0x1a8] sm:$0xff] %v1321_v1  ;;  %1386 = vst [vmem:[%s2139_s29 + $0x1b0] sm:$0xff] %v1322_v63 }
 0x630   : > { %1387 = vst [vmem:[%s2139_s29 + $0x1b8] sm:$0xff] %v1323_v20  ;;  %1388 = vst [vmem:[%s2139_s29 + $0x1c0] sm:$0xff] %v1324_v39 }
 0x631   : > { %1389 = vst [vmem:[%s2139_s29 + $0x1c8] sm:$0xff] %v1325_v51  ;;  %1390 = vst [vmem:[%s2139_s29 + $0x1d0] sm:$0xff] %v1326_v0 }
 0x632   : > { %1391 = vst [vmem:[%s2139_s29 + $0x1d8] sm:$0xff] %v1327_v14  ;;  %1392 = vst [vmem:[%s2139_s29 + $0x1e0] sm:$0xff] %v1328_v18 }
 0x633   : > { %1393 = vst [vmem:[%s2139_s29 + $0x1e8] sm:$0xff] %v1329_v41  ;;  %1394 = vst [vmem:[%s2139_s29 + $0x1f0] sm:$0xff] %v1330_v34 }
 0x634   : > { %1395 = vst [vmem:[%s2139_s29 + $0x1f8] sm:$0xff] %v1331_v16  ;;  %1348 = vst [vmem:[%s2139_s29 + $0x80] sm:$0xff] %v1284_v48 }
 0x635   : > { %1349 = vst [vmem:[%s2139_s29 + $0x88] sm:$0xff] %v1285_v40  ;;  %1350 = vst [vmem:[%s2139_s29 + $0x90] sm:$0xff] %v1286_v52 }
 0x636   : > { %1351 = vst [vmem:[%s2139_s29 + $0x98] sm:$0xff] %v1287_v26  ;;  %1352 = vst [vmem:[%s2139_s29 + $0xa0] sm:$0xff] %v1288_v42 }
 0x637   : > { %1353 = vst [vmem:[%s2139_s29 + $0xa8] sm:$0xff] %v1289_v53  ;;  %1354 = vst [vmem:[%s2139_s29 + $0xb0] sm:$0xff] %v1290_v54 }
 0x638   : > { %1355 = vst [vmem:[%s2139_s29 + $0xb8] sm:$0xff] %v1291_v15  ;;  %1356 = vst [vmem:[%s2139_s29 + $0xc0] sm:$0xff] %v1292_v11 }
 0x639   : > { %1357 = vst [vmem:[%s2139_s29 + $0xc8] sm:$0xff] %v1293_v33  ;;  %1358 = vst [vmem:[%s2139_s29 + $0xd0] sm:$0xff] %v1294_v55 }
 0x63a   : > { %1359 = vst [vmem:[%s2139_s29 + $0xd8] sm:$0xff] %v1295_v45  ;;  %1360 = vst [vmem:[%s2139_s29 + $0xe0] sm:$0xff] %v1296_v56 }
 0x63b   : > { %1361 = vst [vmem:[%s2139_s29 + $0xe8] sm:$0xff] %v1297_v21  ;;  %1362 = vst [vmem:[%s2139_s29 + $0xf0] sm:$0xff] %v1298_v57 }
 0x63c   : > { %1363 = vst [vmem:[%s2139_s29 + $0xf8] sm:$0xff] %v1299_v43 }
 0x63d PF: > { %s3573_s5 = sld [smem:[#allocation14_spill]]  ;;  %s1404_s25 = smul.u32 %s1858_s17, %s1862_s2 }
 0x63e   : > { %s1413_s23 = sshll.u32 %s2139_s29, 4  ;;  %s3574_s7 = sld [smem:[#allocation105_spill]]  ;;  %s3198_s23 = int_to_ptr.vmem [resolvable:$true] %s1413_s23 }
 0x63f   : > { %s1534_s19 = sshll.u32 %s1404_s25, 4  ;;  %s3207_s0 = scalar_lea.sflag [#allocation10], %s383_s24 }
 0x640   : > { %s1744_s1 = scalar_lea.vmem %s3198_s23, 8192  ;;  %p3575_p2 = scmp.ne.s32.totalorder %s3395_s9, 0 }
 0x641   : > { %p1745_p0 = scmp.ne.s32.totalorder %s3198_s23, %s1744_s1  ;;  %s1893_s17 = smov [#allocation11]  }
 0x642   : > { %s1748_s2 = sshll.u32 %s1893_s17, 4  ;;  %s1749_s2 = int_to_ptr.vmem [resolvable:$false] %s1748_s2 }
 0x643   : > { %s1535_s14 = sshll.u32 %s3573_s5, 7  ;;  %p1746_p7 = pnand %p1745_p0, %p3575_p2 }
 0x644   : > { %s1410_s8 = sadd.s32 %s1535_s14, %s1534_s19  ;;  %s1750_s29 = scalar_lea.vmem %s1749_s2, 16384 }
 0x645   : > { %s1536_s26 = sshll.u32 %s1410_s8, 7  ;;  %p1747_p9 = pneg %p1746_p7 }
 0x646   : > { %s3203_s18 = scalar_lea.hbm %s3574_s7, %s1536_s26  ;;  %p1751_p11 = scmp.lt.s32.totalorder %s3198_s23, %s1749_s2 }
 0x647   : > { %p1752_p12 = scmp.lt.s32.totalorder %s1750_s29, %s1744_s1 }
 0x649   : > { %p1753_p13 = por %p1752_p12, %p1751_p11 }
 0x64b   : > { %p1754_p5 = pnand %p1753_p13, %p1747_p9 }
 0x64d   : > { %1757 = shalt.err (!%p1754_p5)
}
 0x64e   : > { %s1758_s24 = scalar_lea.hbm %s3203_s18, 8192  ;;  %s1762_s14 = scalar_lea.hbm %s3574_s7, 32768 }
 0x64f   : > { %p1759_p6 = scmp.ne.s32.totalorder %s3203_s18, %s1758_s24  ;;  %p1763_p3 = scmp.lt.u32.totalorder %s3203_s18, %s3574_s7 }
 0x650   : > { %p1764_p8 = scmp.lt.u32.totalorder %s1762_s14, %s1758_s24  ;;  %p1766_p0 = scmp.lt.u32.totalorder %s1758_s24, %s3203_s18 }
 0x651   : > { %p1760_p10 = pnand %p1759_p6, %p3575_p2 }
 0x652   : > { %p1765_p4 = por %p1764_p8, %p1763_p3 }
 0x653   : > { %p1761_p1 = pneg %p1760_p10 }
 0x654   : > { %p1767_p7 = por %p1766_p0, %p1765_p4 }
 0x656   : > { %p1768_p9 = pnand %p1767_p7, %p1761_p1 }
 0x658   : > { %1771 = shalt.err (!%p1768_p9)
}
 0x659   : > { %s1894_s1 = smov 2048   ;;  %s1895_s26 = smov 4096  }
 0x65a   : > { %s1896_s27 = smov 128  }
 0x65b   : > { %1543 = dma.vmem_to_hbm [thread:$0]  (%p3575_p2), %s3198_s23, 8192, %s3203_s18, %s3207_s0, %s1894_s1, %s1895_s26, %s1896_s27  }
 0x65c PF: > { %p1554_p11 = scmp.ge.s32.totalorder %s1882_s22, 2  ;;  %s1428_s28 = sand.u32 1, %s1834_s11  }
 0x65d   : > { %p3576_p12 = scmp.ne.s32.totalorder %s3396_s6, 0  ;;  %s1429_s17 = scalar_lea.sflag [#allocation10], %s1428_s28 }
 0x65f   : > { %p1550_p13 = pnand %p1554_p11, %p3576_p12 }
 0x661   : > { %1829 = dma.done.wait (!%p1550_p13), %s1429_s17, 8192  }
 0x662   : > { %1831 = vsyncadd (!%p1550_p13), %s1429_s17, 4294959104  ;;  %s27_s22 = sadd.s32 1, %s1882_s22   ;;  %s3578_s17 = sld [smem:[#allocation15_spill]] }
 0x663   : > { %p3236_p5 = scmp.ge.s32.totalorder %s27_s22, 10   ;;  %s3579_s0 = sld [smem:[#allocation16_spill]] }
 0x664   : > { %s3580_s19 = sld [smem:[#allocation17_spill]]  ;;  %s3581_s9 = sld [smem:[#allocation18_spill]] }
 0x665   : > { %s3582_s6 = sld [smem:[#allocation19_spill]]  ;;  %s3584_s11 = smov %s1838_s12 }
 0x666   : > { %s3585_s12 = smov %s1842_s13  ;;  %s3586_s13 = smov %s2064_s20 }
 0x667   : > { %s3587_s14 = smov %s1850_s15  ;;  %s3588_s15 = smov %s1854_s16 }
 0x668   : > { %s3589_s16 = smov %s2061_s4  ;;  %s3591_s18 = smov %s1878_s21 }
 0x669   : > { %s3590_s2 = smov %s3579_s0  ;;  %26 = sbr.rel (!%p3236_p5) target bundleno = 19 (0x13), region = 119 }
 0x66a   : > { %s3592_s20 = smov %s3581_s9 }
 0x66b   : > { %s3593_s21 = smov %s3582_s6 }
 0x670   :  { %1434 = vsyncpa [#allocation9], 1 }
 0x671   :  { %1436 = vsyncpa [#allocation9 + $0x1], 1 }
 0x672   :  { %1437 = vsyncpa [#allocation10], 1 }
 0x673   :  { %1439 = vsyncpa [#allocation10 + $0x1], 1 }

</bundles_post_ra>
